<compile_context>
chip_gen: v7x
topology: tpu7x:2x2x1
jax: 0.10.0
libtpu: 0.0.40
codegen_flags: <defaults>
</compile_context>

<pallas_src>
import jax
import jax.numpy as jnp
from jax.experimental import pallas as pl
from jax.experimental.pallas import tpu as pltpu


def temp_at_kernel(x_ref, w1_ref, b1_ref, g_ref, beta_ref, w2_ref, b2_ref,
                   y_ref, at_ref):
    Bb, T, F = x_ref.shape
    H = w1_ref.shape[1]

    # Load once; compute in f32 regardless of the HBM-facing I/O dtype
    # (v5e has no bf16 VPU/EUP datapath, and it keeps LN/softmax numerics tight).
    x = x_ref[...].astype(jnp.float32)                      # (Bb, T, F)

    # ---- Linear 1 on the MXU: (., F) @ (F, H) + (1, H) ---------------------
    if T % 8 == 0:
        # Merging/splitting the (Bb, T) sublane dims is free only when T % 8 == 0.
        h = jnp.dot(x.reshape(Bb * T, F), w1_ref[...],
                    preferred_element_type=jnp.float32,
                    precision=jax.lax.Precision.HIGHEST).reshape(Bb, T, H)
    else:
        # Batched contraction keeps the 3-D layout (no hidden relayout copy).
        h = jax.lax.dot_general(
            x, w1_ref[...], (((2,), (0,)), ((), ())),
            preferred_element_type=jnp.float32,
            precision=jax.lax.Precision.HIGHEST)            # (Bb, T, H)
    h = h + b1_ref[...]                                     # (1, H) broadcasts

    # ---- LayerNorm over H (eps=1e-5, biased variance = PyTorch default) ----
    mean = jnp.mean(h, axis=-1, keepdims=True)
    var = jnp.mean((h - mean) ** 2, axis=-1, keepdims=True)
    hn = (h - mean) * jax.lax.rsqrt(var + 1e-5)
    hn = hn * g_ref[...] + beta_ref[...]

    t = jnp.tanh(hn)                                        # (Bb, T, H)

    # ---- Linear 2 (H -> 1): VPU multiply + XLU lane reduce ------------------
    logits = jnp.sum(t * w2_ref[...], axis=-1) + b2_ref[0, 0]   # (Bb, T)

    # ---- Softmax over T (lane axis), per batch row --------------------------
    m = jnp.max(logits, axis=-1, keepdims=True)
    e = jnp.exp(logits - m)
    at = e / jnp.sum(e, axis=-1, keepdims=True)             # (Bb, T), f32

    y_ref[...] = (at[:, :, None] * x).astype(y_ref.dtype)
    at_ref[...] = at.astype(at_ref.dtype)                   # f32 output


def _vmem_budget():
    """Per-generation (vmem_limit_bytes, target x-block bytes)."""
    physical = 64 << 20            # conservative default: assume v7x (64 MiB)
    try:
        info = pltpu.get_tpu_info()
        cap = getattr(info, "vmem_capacity_bytes", None)
        if cap:
            physical = int(cap)
    except Exception:
        pass
    # Ask for at most half of physical VMEM (v7x -> 32 MiB, v5e/v6e -> 64 MiB).
    vmem_limit = min(physical // 2, 64 << 20)
    # Double-buffered x + double-buffered y + f32 intermediates fit in roughly
    # 5x the x-block size -> keep each x block at ~1/8 of the limit
    # (v7x ~4 MiB, v5e/v6e ~8 MiB blocks).
    target_block = max(1 << 20, vmem_limit // 8)
    return vmem_limit, target_block


def _choose_block_batch(B, T, F, itemsize, target_bytes, min_bytes=1 << 20):
    """Pick Bb = batches per grid step.

    Priorities:
      1. divides B exactly,
      2. Bb % 8 == 0 or Bb == B  ((8,128) rule for the (Bb, T) attention block),
      3. x block <= target_bytes (per-generation VMEM budget),
      4. prefer >= 4 grid steps (even count, so both v7x TCs stay busy) while
         keeping the block >= ~1 MiB to amortize the ~0.35 us/step overhead,
      5. else >= 2 steps (even preferred),
      6. largest remaining.
    """
    divisors = [d for d in range(1, B + 1) if B % d == 0]
    cands = [d for d in divisors if d % 8 == 0 or d == B]

    def blk(d):
        return d * T * F * itemsize

    def steps(d):
        return B // d

    small = [d for d in cands if blk(d) <= target_bytes]
    if small:
        cands = small

    for pred in (
        lambda d: steps(d) >= 4 and steps(d) % 2 == 0 and blk(d) >= min_bytes,
        lambda d: steps(d) >= 4 and blk(d) >= min_bytes,
        lambda d: steps(d) >= 2 and steps(d) % 2 == 0,
        lambda d: steps(d) >= 2,
    ):
        good = [d for d in cands if pred(d)]
        if good:
            return max(good)
    return max(cands)


def temp_at_forward(x, params, *, block_batch=None):
    """x: (B, T, F) float32 or bfloat16. Returns (y (B,T,F) in x.dtype,
    at_map (B,T,1) float32)."""
    B, T, F = x.shape
    H = F // 4
    w1, b1, gamma, beta, w2, b2 = params

    vmem_limit, target_block = _vmem_budget()
    itemsize = jnp.dtype(x.dtype).itemsize
    Bb = block_batch if block_batch is not None else _choose_block_batch(
        B, T, F, itemsize, target_block)
    assert B % Bb == 0, f"block_batch={Bb} must divide B={B}"
    assert Bb % 8 == 0 or Bb == B, (
        f"block_batch={Bb}: the (Bb, T) attention block needs Bb % 8 == 0 "
        f"(or Bb == B) to satisfy the TPU (8, 128) tiling rule")

    # Parameters kept resident in f32 with clean 2-D lane layouts.
    w1_f32 = w1.astype(jnp.float32)
    b1_2d = b1.reshape(1, H).astype(jnp.float32)
    gamma_2d = gamma.reshape(1, H).astype(jnp.float32)
    beta_2d = beta.reshape(1, H).astype(jnp.float32)
    w2_2d = w2.reshape(1, H).astype(jnp.float32)     # (H,1) column -> (1,H) row
    b2_2d = b2.reshape(1, 1).astype(jnp.float32)     # scalar, lives in SMEM

    out_shapes = (
        jax.ShapeDtypeStruct((B, T, F), x.dtype),     # y follows the I/O dtype
        jax.ShapeDtypeStruct((B, T), jnp.float32),    # attention weights stay f32
    )

    grid_spec = pltpu.PrefetchScalarGridSpec(
        num_scalar_prefetch=0,
        grid=(B // Bb,),
        in_specs=[
            pl.BlockSpec((Bb, T, F), lambda b: (b, 0, 0)),            # x
            pl.BlockSpec((F, H), lambda b: (0, 0)),                   # w1
            pl.BlockSpec((1, H), lambda b: (0, 0)),                   # b1
            pl.BlockSpec((1, H), lambda b: (0, 0)),                   # gamma
            pl.BlockSpec((1, H), lambda b: (0, 0)),                   # beta
            pl.BlockSpec((1, H), lambda b: (0, 0)),                   # w2 row
            pl.BlockSpec(memory_space=pltpu.MemorySpace.SMEM),        # b2 scalar
        ],
        out_specs=[
            pl.BlockSpec((Bb, T, F), lambda b: (b, 0, 0)),            # y
            pl.BlockSpec((Bb, T), lambda b: (b, 0)),                  # at (lane-dense)
        ],
    )

    # Advisory cost: this call is bandwidth-bound (read x + write y dominate).
    bytes_accessed = int(2 * B * T * F * itemsize + B * T * 4
                         + (F * H + 4 * H + 2) * 4)
    cost = pl.CostEstimate(
        flops=int(2 * B * T * F * H + B * T * (8 * H + 16)),
        transcendentals=int(B * T * (H + 1)),
        bytes_accessed=bytes_accessed)

    y, at = pl.pallas_call(
        temp_at_kernel,
        out_shape=out_shapes,
        grid_spec=grid_spec,
        compiler_params=pltpu.CompilerParams(
            dimension_semantics=("parallel",),
            vmem_limit_bytes=vmem_limit),
        cost_estimate=cost,
    )(x, w1_f32, b1_2d, gamma_2d, beta_2d, w2_2d, b2_2d)

    at_map = at[..., None]                            # (B, T, 1), float32
    return y, at_map


def temp_at_reference(x, params):
    """Pure-JAX reference mirroring the PyTorch module (f32)."""
    w1, b1, gamma, beta, w2, b2 = params
    xf = x.astype(jnp.float32)
    h = jnp.einsum("btf,fh->bth", xf, w1, precision="highest") + b1
    mean = jnp.mean(h, axis=-1, keepdims=True)
    var = jnp.mean((h - mean) ** 2, axis=-1, keepdims=True)
    hn = (h - mean) / jnp.sqrt(var + 1e-5) * gamma + beta
    t = jnp.tanh(hn)
    logits = jnp.einsum("bth,ho->bto", t, w2, precision="highest") + b2  # (B,T,1)
    at = jax.nn.softmax(logits[..., 0], axis=-1)[..., None]              # (B,T,1)
    return at * xf, at


def init_params(key, fdim):
    H = fdim // 4
    k1, k2, k3, k4 = jax.random.split(key, 4)
    # Deterministic init mimicking nn.Linear defaults (uniform +/- 1/sqrt(fan_in)).
    lim1 = 1.0 / jnp.sqrt(fdim)
    lim2 = 1.0 / jnp.sqrt(H)
    w1 = jax.random.uniform(k1, (fdim, H), jnp.float32, -lim1, lim1)
    b1 = jax.random.uniform(k2, (H,), jnp.float32, -lim1, lim1)
    gamma = jnp.ones((H,), jnp.float32)
    beta = jnp.zeros((H,), jnp.float32)
    w2 = jax.random.uniform(k3, (H, 1), jnp.float32, -lim2, lim2)
    b2 = jax.random.uniform(k4, (1,), jnp.float32, -lim2, lim2)
    return (w1, b1, gamma, beta, w2, b2)


if __name__ == "__main__":
    B, T, F = 16, 8, 128          # batch, sequence length, fdim (H = 32)
    key = jax.random.PRNGKey(0)
    kx, kp = jax.random.split(key)
    x = jax.random.normal(kx, (B, T, F), dtype=jnp.float32)
    params = init_params(kp, F)

    # f32 I/O path: must match the f32 reference tightly.
    y, at_map = temp_at_forward(x, params)
    jax.block_until_ready((y, at_map))

    y_ref, at_ref = temp_at_reference(x, params)
    assert y.shape == (B, T, F) and at_map.shape == (B, T, 1)
    assert jnp.allclose(y, y_ref, atol=1e-5, rtol=1e-5)
    assert jnp.allclose(at_map, at_ref, atol=1e-5, rtol=1e-5)

    # bf16 I/O path (halves HBM traffic on v6e/v7x; compute stays f32 in-kernel).
    y_bf, at_bf = temp_at_forward(x.astype(jnp.bfloat16), params)
    jax.block_until_ready((y_bf, at_bf))
    assert y_bf.dtype == jnp.bfloat16 and at_bf.dtype == jnp.float32
    assert jnp.allclose(y_bf.astype(jnp.float32), y_ref, atol=2e-2, rtol=2e-2)
    assert jnp.allclose(at_bf, at_ref, atol=2e-2, rtol=2e-2)

    print("KERNEL_OK")
</pallas_src>

<mosaic_0001>
module attributes {stable_mosaic.version = 11 : i64} {
  func.func @temp_at_kernel(%arg0: i32, %arg1: memref<8x8x128xf32, #tpu.memory_space<vmem>>, %arg2: memref<128x32xf32, #tpu.memory_space<vmem>>, %arg3: memref<1x32xf32, #tpu.memory_space<vmem>>, %arg4: memref<1x32xf32, #tpu.memory_space<vmem>>, %arg5: memref<1x32xf32, #tpu.memory_space<vmem>>, %arg6: memref<1x32xf32, #tpu.memory_space<vmem>>, %arg7: memref<1x1xf32, #tpu.memory_space<smem>>, %arg8: memref<8x8x128xf32, #tpu.memory_space<vmem>>, %arg9: memref<8x8xf32, #tpu.memory_space<vmem>>) attributes {dimension_semantics = [#tpu.dimension_semantics<parallel>], iteration_bounds = array<i64: 2>, scalar_prefetch = 0 : i64, scratch_operands = 0 : i64, tpu.core_type = #tpu.core_type<tc>, window_params = [{transform_indices = @transform_0, window_bounds = array<i64: 8, 8, 128>}, {pipeline_mode = #tpu.pipeline_mode<synchronous>, transform_indices = @transform_1, window_bounds = array<i64: 128, 32>}, {pipeline_mode = #tpu.pipeline_mode<synchronous>, transform_indices = @transform_2, window_bounds = array<i64: 1, 32>}, {pipeline_mode = #tpu.pipeline_mode<synchronous>, transform_indices = @transform_3, window_bounds = array<i64: 1, 32>}, {pipeline_mode = #tpu.pipeline_mode<synchronous>, transform_indices = @transform_4, window_bounds = array<i64: 1, 32>}, {pipeline_mode = #tpu.pipeline_mode<synchronous>, transform_indices = @transform_5, window_bounds = array<i64: 1, 32>}, {transform_indices = @transform_6, window_bounds = array<i64: 1, 1>}, {transform_indices = @transform_7, window_bounds = array<i64: 8, 8, 128>}, {transform_indices = @transform_8, window_bounds = array<i64: 8, 8>}]} {
    %c0 = arith.constant 0 : index
    %c0_0 = arith.constant 0 : index
    %c0_1 = arith.constant 0 : index
    %0 = vector.load %arg1[%c0, %c0_0, %c0_1] : memref<8x8x128xf32, #tpu.memory_space<vmem>>, vector<8x8x128xf32>
    %1 = vector.shape_cast %0 : vector<8x8x128xf32> to vector<64x128xf32>
    %c0_2 = arith.constant 0 : index
    %c0_3 = arith.constant 0 : index
    %2 = vector.load %arg2[%c0_2, %c0_3] : memref<128x32xf32, #tpu.memory_space<vmem>>, vector<128x32xf32>
    %cst = arith.constant dense<0.000000e+00> : vector<64x32xf32>
    %3 = tpu.matmul %1, %2, %cst {dimension_numbers = #tpu.dot_dimension_numbers<[1], [0], [0], [1], [0, 0, 1, 1], [], []>, precision = #tpu.contract_precision<fp32>} : vector<64x128xf32>, vector<128x32xf32>, vector<64x32xf32> -> vector<64x32xf32>
    %4 = vector.shape_cast %3 : vector<64x32xf32> to vector<8x8x32xf32>
    %c0_4 = arith.constant 0 : index
    %c0_5 = arith.constant 0 : index
    %5 = vector.load %arg3[%c0_4, %c0_5] : memref<1x32xf32, #tpu.memory_space<vmem>>, vector<1x32xf32>
    %6 = vector.shape_cast %5 : vector<1x32xf32> to vector<1x1x32xf32>
    %7 = vector.broadcast %6 : vector<1x1x32xf32> to vector<8x8x32xf32>
    %8 = arith.addf %4, %7 : vector<8x8x32xf32>
    %cst_6 = arith.constant dense<0.000000e+00> : vector<8x8xf32>
    %9 = vector.multi_reduction <add>, %8, %cst_6 [2] : vector<8x8x32xf32> to vector<8x8xf32>
    %10 = vector.shape_cast %9 : vector<8x8xf32> to vector<8x8x1xf32>
    %cst_7 = arith.constant 3.200000e+01 : f32
    %11 = vector.broadcast %cst_7 : f32 to vector<8x8x1xf32>
    %12 = arith.divf %10, %11 : vector<8x8x1xf32>
    %13 = vector.broadcast %12 : vector<8x8x1xf32> to vector<8x8x32xf32>
    %14 = arith.subf %8, %13 : vector<8x8x32xf32>
    %15 = arith.mulf %14, %14 : vector<8x8x32xf32>
    %cst_8 = arith.constant dense<0.000000e+00> : vector<8x8xf32>
    %16 = vector.multi_reduction <add>, %15, %cst_8 [2] : vector<8x8x32xf32> to vector<8x8xf32>
    %17 = vector.shape_cast %16 : vector<8x8xf32> to vector<8x8x1xf32>
    %cst_9 = arith.constant 3.200000e+01 : f32
    %18 = vector.broadcast %cst_9 : f32 to vector<8x8x1xf32>
    %19 = arith.divf %17, %18 : vector<8x8x1xf32>
    %20 = vector.broadcast %12 : vector<8x8x1xf32> to vector<8x8x32xf32>
    %21 = arith.subf %8, %20 : vector<8x8x32xf32>
    %cst_10 = arith.constant 9.99999974E-6 : f32
    %22 = vector.broadcast %cst_10 : f32 to vector<8x8x1xf32>
    %23 = arith.addf %19, %22 : vector<8x8x1xf32>
    %24 = math.rsqrt %23 : vector<8x8x1xf32>
    %25 = vector.broadcast %24 : vector<8x8x1xf32> to vector<8x8x32xf32>
    %26 = arith.mulf %21, %25 : vector<8x8x32xf32>
    %c0_11 = arith.constant 0 : index
    %c0_12 = arith.constant 0 : index
    %27 = vector.load %arg4[%c0_11, %c0_12] : memref<1x32xf32, #tpu.memory_space<vmem>>, vector<1x32xf32>
    %28 = vector.shape_cast %27 : vector<1x32xf32> to vector<1x1x32xf32>
    %29 = vector.broadcast %28 : vector<1x1x32xf32> to vector<8x8x32xf32>
    %30 = arith.mulf %26, %29 : vector<8x8x32xf32>
    %c0_13 = arith.constant 0 : index
    %c0_14 = arith.constant 0 : index
    %31 = vector.load %arg5[%c0_13, %c0_14] : memref<1x32xf32, #tpu.memory_space<vmem>>, vector<1x32xf32>
    %32 = vector.shape_cast %31 : vector<1x32xf32> to vector<1x1x32xf32>
    %33 = vector.broadcast %32 : vector<1x1x32xf32> to vector<8x8x32xf32>
    %34 = arith.addf %30, %33 : vector<8x8x32xf32>
    %35 = math.tanh %34 : vector<8x8x32xf32>
    %c0_15 = arith.constant 0 : index
    %c0_16 = arith.constant 0 : index
    %36 = vector.load %arg6[%c0_15, %c0_16] : memref<1x32xf32, #tpu.memory_space<vmem>>, vector<1x32xf32>
    %37 = vector.shape_cast %36 : vector<1x32xf32> to vector<1x1x32xf32>
    %38 = vector.broadcast %37 : vector<1x1x32xf32> to vector<8x8x32xf32>
    %39 = arith.mulf %35, %38 : vector<8x8x32xf32>
    %cst_17 = arith.constant dense<0.000000e+00> : vector<8x8xf32>
    %40 = vector.multi_reduction <add>, %39, %cst_17 [2] : vector<8x8x32xf32> to vector<8x8xf32>
    %c0_18 = arith.constant 0 : index
    %c0_19 = arith.constant 0 : index
    %41 = memref.load %arg7[%c0_18, %c0_19] : memref<1x1xf32, #tpu.memory_space<smem>>
    %42 = vector.broadcast %41 : f32 to vector<8x8xf32>
    %43 = arith.addf %40, %42 : vector<8x8xf32>
    %cst_20 = arith.constant dense<0xFF800000> : vector<8xf32>
    %44 = vector.multi_reduction <maximumf>, %43, %cst_20 [1] : vector<8x8xf32> to vector<8xf32>
    %45 = vector.shape_cast %44 : vector<8xf32> to vector<8x1xf32>
    %46 = vector.broadcast %45 : vector<8x1xf32> to vector<8x8xf32>
    %47 = arith.subf %43, %46 : vector<8x8xf32>
    %48 = math.exp %47 : vector<8x8xf32>
    %cst_21 = arith.constant dense<0.000000e+00> : vector<8xf32>
    %49 = vector.multi_reduction <add>, %48, %cst_21 [1] : vector<8x8xf32> to vector<8xf32>
    %50 = vector.shape_cast %49 : vector<8xf32> to vector<8x1xf32>
    %51 = vector.broadcast %50 : vector<8x1xf32> to vector<8x8xf32>
    %52 = arith.divf %48, %51 : vector<8x8xf32>
    %53 = vector.shape_cast %52 : vector<8x8xf32> to vector<8x8x1xf32>
    %54 = vector.broadcast %53 : vector<8x8x1xf32> to vector<8x8x128xf32>
    %55 = arith.mulf %54, %0 : vector<8x8x128xf32>
    %c0_22 = arith.constant 0 : index
    %c0_23 = arith.constant 0 : index
    %c0_24 = arith.constant 0 : index
    %56 = vector.load %arg8[%c0_22, %c0_23, %c0_24] : memref<8x8x128xf32, #tpu.memory_space<vmem>>, vector<8x8x128xf32>
    tpu.vector_store %arg8[%c0_22, %c0_23, %c0_24], %55 {strides = array<i32>} : memref<8x8x128xf32, #tpu.memory_space<vmem>>, vector<8x8x128xf32>,
    %c0_25 = arith.constant 0 : index
    %c0_26 = arith.constant 0 : index
    %57 = vector.load %arg9[%c0_25, %c0_26] : memref<8x8xf32, #tpu.memory_space<vmem>>, vector<8x8xf32>
    tpu.vector_store %arg9[%c0_25, %c0_26], %52 {strides = array<i32>} : memref<8x8xf32, #tpu.memory_space<vmem>>, vector<8x8xf32>,
    return
  }
  func.func @transform_0(%arg0: i32) -> (i32, i32, i32) {
    %c0_i32 = arith.constant 0 : i32
    %c0_i32_0 = arith.constant 0 : i32
    %c0_i32_1 = arith.constant 0 : i32
    return %arg0, %c0_i32, %c0_i32_0 : i32, i32, i32
  }
  func.func @transform_1(%arg0: i32) -> (i32, i32) {
    %c0_i32 = arith.constant 0 : i32
    %c0_i32_0 = arith.constant 0 : i32
    %c0_i32_1 = arith.constant 0 : i32
    return %c0_i32, %c0_i32_0 : i32, i32
  }
  func.func @transform_2(%arg0: i32) -> (i32, i32) {
    %c0_i32 = arith.constant 0 : i32
    %c0_i32_0 = arith.constant 0 : i32
    %c0_i32_1 = arith.constant 0 : i32
    return %c0_i32, %c0_i32_0 : i32, i32
  }
  func.func @transform_3(%arg0: i32) -> (i32, i32) {
    %c0_i32 = arith.constant 0 : i32
    %c0_i32_0 = arith.constant 0 : i32
    %c0_i32_1 = arith.constant 0 : i32
    return %c0_i32, %c0_i32_0 : i32, i32
  }
  func.func @transform_4(%arg0: i32) -> (i32, i32) {
    %c0_i32 = arith.constant 0 : i32
    %c0_i32_0 = arith.constant 0 : i32
    %c0_i32_1 = arith.constant 0 : i32
    return %c0_i32, %c0_i32_0 : i32, i32
  }
  func.func @transform_5(%arg0: i32) -> (i32, i32) {
    %c0_i32 = arith.constant 0 : i32
    %c0_i32_0 = arith.constant 0 : i32
    %c0_i32_1 = arith.constant 0 : i32
    return %c0_i32, %c0_i32_0 : i32, i32
  }
  func.func @transform_6(%arg0: i32) -> (i32, i32) {
    %c0_i32 = arith.constant 0 : i32
    %c0_i32_0 = arith.constant 0 : i32
    %c0_i32_1 = arith.constant 0 : i32
    return %c0_i32, %c0_i32_0 : i32, i32
  }
  func.func @transform_7(%arg0: i32) -> (i32, i32, i32) {
    %c0_i32 = arith.constant 0 : i32
    %c0_i32_0 = arith.constant 0 : i32
    %c0_i32_1 = arith.constant 0 : i32
    return %arg0, %c0_i32, %c0_i32_0 : i32, i32, i32
  }
  func.func @transform_8(%arg0: i32) -> (i32, i32) {
    %c0_i32 = arith.constant 0 : i32
    %c0_i32_0 = arith.constant 0 : i32
    return %arg0, %c0_i32 : i32, i32
  }
}

</mosaic_0001>

<bundles_post_ra>
// kernel: tpu_custom_call.1
= control target key start
LH: loop header
LB: loop body
LE: loop exit
PB: predicated region body
PF: predicated region fallthrough
CT: control target
= control target key end

     0   :  { %s3582_s0 = inlined_call_operand.vmem [shape: f32[16,8,128], index: 0, kind: input, shape index: {}]   ;;  %s3583_s1 = inlined_call_operand.vmem [shape: f32[128,32], index: 1, kind: input, shape index: {}]   ;;  %s3584_s2 = inlined_call_operand.vmem [shape: f32[1,32], index: 2, kind: input, shape index: {}]   ;;  %s3585_s3 = inlined_call_operand.vmem [shape: f32[1,32], index: 3, kind: input, shape index: {}]   ;;  %s3586_s4 = inlined_call_operand.vmem [shape: f32[1,32], index: 4, kind: input, shape index: {}]   ;;  %s3587_s5 = inlined_call_operand.vmem [shape: f32[1,32], index: 5, kind: input, shape index: {}]   ;;  %s3588_s6 = inlined_call_operand.<no memory space> [shape: f32[1,1], index: 6, kind: input, shape index: {}]   ;;  %s3589_s7 = inlined_call_operand.hbm [shape: f32[16,8,128], index: 7, kind: output, shape index: {0}]   ;;  %s3590_s8 = inlined_call_operand.vmem [shape: f32[16,8], index: 8, kind: output, shape index: {1}]  }
   0x1   :  { %14 = sst [smem:[#allocation2]] %s3588_s6 }
   0x2   :  { %15 = vsyncpa [#allocation4], 0 }
   0x3   :  { %17 = vsyncpa [#allocation4 + $0x1], 0  ;;  %s2845_s29 = smov 0   ;;  %s2847_s30 = smov 0  }
   0x4   :  { %s2849_s9 = smov 0   ;;  %s2851_s10 = smov 0  }
   0x5 LB: > { %s2866_s6 = sadd.s32 4294967295, %s2791_s10   ;;  %s1955_s11 = sadd.s32 4294967294, %s2791_s10   ;;  %s2791_s10 = sphi %s2851_s10, %s3647_s10   ;;  %s2787_s9 = sphi %s2849_s9, %s3646_s9   ;;  %s2783_s30 = sphi %s2847_s30, %s3645_s30   ;;  %s2779_s29 = sphi %s2845_s29, %s3644_s29  }
   0x6   : > { %s2870_s12 = sadd.s32 1, %s2791_s10   ;;  %s182_s13 = sadd.s32 1, %s2787_s9 }
   0x7   : > { %s179_s14 = ssub.s32 %s2791_s10, %s2870_s12  ;;  %p192_p0 = scmp.ne.s32.totalorder %s2787_s9, %s2783_s30 }
   0x8   : > { %p180_p1 = scmp.eq.s32.totalorder %s179_s14, 0  ;;  %p193_p2 = scmp.eq.s32.totalorder %s2866_s6, 1 }
   0x9   : > { %p198_p3 = scmp.ne.s32.totalorder %s2783_s30, %s2779_s29  ;;  %p199_p4 = scmp.eq.s32.totalorder %s1955_s11, 1 }
   0xa   : > { %s2881_s15 = scalar_select %p180_p1, %s2787_s9, %s182_s13  }
   0xb   : > { %p2883_p5 = por %p193_p2, %p192_p0  ;;  %p2887_p6 = por %p199_p4, %p198_p3 }
   0xc   : > { %p1958_p7 = scmp.ge.s32.totalorder %s2791_s10, 1  ;;  %p270_p8 = scmp.lt.s32.totalorder %s2791_s10, 3 }
   0xe   : > { %p271_p9 = pnand %p1958_p7, %p270_p8 }
  0x10   : > { %274 = sbr.rel (%p271_p9) target bundleno = 1479 (0x5c7), region = 48 }
  0x17   : > { %v327_v0 = vld [vmem:[%s3583_s1] sm:$0xff]  ;;  %v328_v1 = vld [vmem:[%s3583_s1 + $0x8] sm:$0xff]  ;;  %v329_v2 = vld [vmem:[%s3583_s1 + $0x10] sm:$0xff]  ;;  %s1960_s24 = sshll.u32 %s2866_s6, 3  ;;  %vm1300_vm0 = vcmask 261120   ;;  %s1483_s22 = sld [smem:[#allocation2]] }
  0x18   : > { %v344_v3 = vand.u32 4294901760, %v327_v0  ;;  %v347_v4 = vand.u32 4294901760, %v328_v1  ;;  %v2906_v5 = vld [vmem:[%s3583_s1 + $0x18] sm:$0xff]  ;;  %v350_v6 = vand.u32 4294901760, %v329_v2  ;;  %v2911_v7 = vld [vmem:[%s3583_s1 + $0x20] sm:$0xff]  ;;  %v2916_v8 = vld [vmem:[%s3583_s1 + $0x28] sm:$0xff] }
  0x19   : > { %v353_v9 = vand.u32 4294901760, %v2906_v5  ;;  %v356_v11 = vand.u32 4294901760, %v2911_v7  ;;  %v359_v12 = vand.u32 4294901760, %v2916_v8  ;;  %v2928_v14 = vld [vmem:[%s3583_s1 + $0x30] sm:$0xff]  ;;  %v2933_v15 = vld [vmem:[%s3583_s1 + $0x38] sm:$0xff]  ;;  %p309_p10 = scmp.lt.s32.totalorder %s1960_s24, 15 }
  0x1a   : > { %v2919_v10 = vpack.c.bf16 %v347_v4, %v344_v3  ;;  %v362_v17 = vand.u32 4294901760, %v2928_v14  ;;  %v365_v18 = vand.u32 4294901760, %v2933_v15  ;;  %v2952_v19 = vld [vmem:[%s3583_s1 + $0x40] sm:$0xff]  ;;  %v2957_v20 = vld [vmem:[%s3583_s1 + $0x48] sm:$0xff]  ;;  %v2980_v25 = vld [vmem:[%s3583_s1 + $0x50] sm:$0xff]  ;;  %v2992_v29 = vsub.f32 %v327_v0, %v344_v3  ;;  %s299_s23 = sand.u32 1, %s2783_s30  }
  0x1b   : > { %v2923_v13 = vpack.c.bf16 %v353_v9, %v350_v6  ;;  %s3649_s24 = smov (!%p309_p10, %s1960_s24), 15  ;;  %v2945_v16 = vpack.c.bf16 %v359_v12, %v356_v11  ;;  %v368_v23 = vand.u32 4294901760, %v2952_v19  ;;  %v371_v24 = vand.u32 4294901760, %v2957_v20  ;;  %v2987_v27 = vld [vmem:[%s3583_s1 + $0x58] sm:$0xff]  ;;  %v3012_v35 = vld [vmem:[%s3583_s1 + $0x60] sm:$0xff]  ;;  %v3017_v36 = vld [vmem:[%s3583_s1 + $0x68] sm:$0xff] }
  0x1c   : > { %2382 = vmatprep.subr.bf16.mxu1 %v2919_v10  ;;  %2478 = vmatprep.subr.bf16.mxu0 %v2919_v10  ;;  %s1961_s26 = sshll.u32 %s3649_s24, 3  ;;  %v2973_v22 = vpack.c.bf16 %v365_v18, %v362_v17  ;;  %v2994_v30 = vsub.f32 %v328_v1, %v347_v4  ;;  %v374_v32 = vand.u32 4294901760, %v2980_v25  ;;  %v3596_v34 = vand.u32 4294901760, %v2987_v27  ;;  %v3027_v40 = vld [vmem:[%s3583_s1 + $0x70] sm:$0xff]  ;;  %v3032_v41 = vld [vmem:[%s3583_s1 + $0x78] sm:$0xff]  ;;  %s1959_s25 = sshll.u32 %s299_s23, 6 }
  0x1d   : > { %2384 = vmatpush3.bf16.msra.mxu1 %v2919_v10  ;;  %2480 = vmatpush3.bf16.msra.mxu0 %v2919_v10  ;;  %s2962_s11 = scalar_lea.vmem %s3582_s0, %s1961_s26  ;;  %v3006_v33 = vpack.c.bf16 %v371_v24, %v368_v23  ;;  %v3020_v38 = vsub.f32 %v329_v2, %v350_v6  ;;  %v507_v43 = vand.u32 4294901760, %v2992_v29  ;;  %v3594_v46 = vand.u32 4294901760, %v3012_v35  ;;  %s3492_s26 = scalar_lea.vmem [#allocation3], %s1959_s25 }
  0x1e   : > { %2386 = vmatprep.subr.bf16.mxu1 %v2923_v13  ;;  %2482 = vmatprep.subr.bf16.mxu0 %v2923_v13  ;;  %v319_v21 = vld [vmem:[%s2962_s11] sm:$0xff]  ;;  %3617 = vst [vmem:[#allocation6_spill] sm:$0xff] %v2973_v22  ;;  %v320_v31 = vld [vmem:[%s2962_s11 + $0x8] sm:$0xff]  ;;  %v514_v44 = vand.u32 4294901760, %v2994_v30  ;;  %v321_v45 = vld [vmem:[%s2962_s11 + $0x10] sm:$0xff]  ;;  %v3593_v47 = vand.u32 4294901760, %v3017_v36  ;;  %v3043_v48 = vsub.f32 %v2906_v5, %v353_v9  ;;  %v3052_v50 = vpack.c.bf16 %v3596_v34, %v374_v32 }
  0x1f   : > { %v2982_v26 = vand.u32 4294901760, %v319_v21  ;;  %3619 = vst [vmem:[#allocation8_spill] sm:$0xff] %v3006_v33  ;;  %v3022_v39 = vand.u32 4294901760, %v320_v31  ;;  %v322_v49 = vld [vmem:[%s2962_s11 + $0x18] sm:$0xff]  ;;  %v521_v52 = vand.u32 4294901760, %v3020_v38  ;;  %v3592_v53 = vand.u32 4294901760, %v3027_v40 }
  0x20   : > { %3620 = vst [vmem:[#allocation9_spill] sm:$0xff] %v3052_v50  ;;  %v3591_v54 = vand.u32 4294901760, %v3032_v41  ;;  %v3060_v56 = vand.u32 4294901760, %v321_v45  ;;  %v508_v57 = vsub.f32 %v2992_v29, %v507_v43  ;;  %v515_v58 = vsub.f32 %v2994_v30, %v514_v44  ;;  %v323_v60 = vld [vmem:[%s2962_s11 + $0x20] sm:$0xff]  ;;  %p315_p11 = scmp.lt.s32.totalorder %s2866_s6, 1  ;;  %s1972_s24 = sshll.u32 %s2866_s6, 10 }
  0x21   : > { %2388 = vmatpush3.bf16.msra.mxu1 %v2923_v13  ;;  %2484 = vmatpush3.bf16.msra.mxu0 %v2923_v13  ;;  %v2990_v28 = vsub.f32 %v319_v21, %v2982_v26  ;;  %v3058_v55 = vsub.f32 %v320_v31, %v3022_v39  ;;  %v3064_v59 = vand.u32 4294901760, %v322_v49  ;;  %v3073_v61 = vpack.c.bf16 %v3593_v47, %v3594_v46  ;;  %v325_v31 = vld [vmem:[%s2962_s11 + $0x30] sm:$0xff]  ;;  %s1866_s13 = sshll.u32 %s3492_s26, 4  ;;  %s3528_s21 = scalar_lea.hbm %s3589_s7, %s1972_s24  ;;  %s3530_s13 = int_to_ptr.vmem [resolvable:$true] %s1866_s13 }
  0x22   : > { %2390 = vmatprep.subr.bf16.mxu1 %v2945_v16  ;;  %2486 = vmatprep.subr.bf16.mxu0 %v2945_v16  ;;  %v528_v62 = vand.u32 4294901760, %v3043_v48  ;;  %v3079_v63 = vsub.f32 %v2911_v7, %v356_v11  ;;  %v522_v0 = vsub.f32 %v3020_v38, %v521_v52  ;;  %v3087_v1 = vsub.f32 %v2916_v8, %v359_v12  ;;  %v324_v12 = vld [vmem:[%s2962_s11 + $0x28] sm:$0xff]  ;;  %s316_s27 = scalar_select %p315_p11, %s2866_s6, 1 }
  0x23   : > { %3618 = vst [vmem:[#allocation7_spill] sm:$0xff] %v2990_v28  ;;  %v426_v37 = vand.u32 4294901760, %v2990_v28  ;;  %3621 = vst [vmem:[#allocation10_spill] sm:$0xff] %v3073_v61  ;;  %v3092_v2 = vsub.f32 %v2928_v14, %v362_v17  ;;  %v3098_v3 = vpack.c.bf16 %v3591_v54, %v3592_v53  ;;  %v3595_v4 = vand.u32 4294901760, %v3058_v55  ;;  %s2729_s25 = scalar_lea.vmem %s3530_s13, 1024 }
  0x24   : > { %v3102_v5 = vsub.f32 %v321_v45, %v3060_v56  ;;  %v3104_v6 = vand.u32 4294901760, %v323_v60  ;;  %v509_v7 = vand.u32 4294901760, %v508_v57  ;;  %v516_v8 = vand.u32 4294901760, %v515_v58  ;;  %s1962_s28 = sshll.u32 %s316_s27, 3  ;;  %p2730_p12 = scmp.ne.s32.totalorder %s3530_s13, %s2729_s25 }
  0x25   : > { %2392 = vmatpush3.bf16.msra.mxu1 %v2945_v16  ;;  %2488 = vmatpush3.bf16.msra.mxu0 %v2945_v16  ;;  %v427_v42 = vsub.f32 %v2990_v28, %v426_v37  ;;  %3622 = vst [vmem:[#allocation11_spill] sm:$0xff] %v3098_v3  ;;  %v3109_v9 = vsub.f32 %v2933_v15, %v365_v18  ;;  %v523_v15 = vand.u32 4294901760, %v522_v0  ;;  %v535_v18 = vand.u32 4294901760, %v3079_v63  ;;  %s318_s19 = scalar_lea.vmem %s3590_s8, %s1962_s28 }
  0x26   : > { %2394 = vmatprep.subr.bf16.mxu1 %v2973_v22  ;;  %2490 = vmatprep.subr.bf16.mxu0 %v2973_v22  ;;  %3623 = vst [vmem:[#allocation12_spill] sm:$0xff] %v3102_v5  ;;  %v3112_v11 = vsub.f32 %v322_v49, %v3064_v59  ;;  %v2509_v14 = vpack.c.bf16 %v514_v44, %v507_v43  ;;  %v446_v44 = vand.u32 4294901760, %v3102_v5  ;;  %v3133_v49 = vand.u32 4294901760, %v324_v12  ;;  %p2731_p13 = pnand %p2730_p12, %p2883_p5 }
  0x27   : > { %2281 = vmatprep.mubr.f32.mxu0 %v426_v37  ;;  %v428_v51 = vand.u32 4294901760, %v427_v42  ;;  %v529_v17 = vsub.f32 %v3043_v48, %v528_v62  ;;  %v3118_v21 = vpack.c.bf16 %v528_v62, %v521_v52  ;;  %v542_v37 = vand.u32 4294901760, %v3087_v1 }
  0x28   : > { %3624 = vst [vmem:[#allocation13_spill] sm:$0xff] %v3112_v11  ;;  %v3597_v42 = vand.u32 4294901760, %v3092_v2  ;;  %v437_v43 = vsub.f32 %v3058_v55, %v3595_v4  ;;  %v3131_v45 = vsub.f32 %v323_v60, %v3104_v6  ;;  %v2413_v52 = vpack.c.bf16 %v516_v8, %v509_v7  ;;  %p2732_p0 = pneg %p2731_p13 }
  0x29   : > { %2396 = vmatpush3.bf16.msra.mxu1 %v2973_v22  ;;  %2492 = vmatpush3.bf16.msra.mxu0 %v2973_v22  ;;  %v556_v57 = vand.u32 4294901760, %v3109_v9  ;;  %v456_v58 = vand.u32 4294901760, %v3112_v11  ;;  %v3138_v62 = vand.u32 4294901760, %v325_v31  ;;  %v530_v0 = vand.u32 4294901760, %v529_v17 }
  0x2a   : > { %2398 = vmatprep.subr.bf16.mxu1 %v3006_v33  ;;  %2494 = vmatprep.subr.bf16.mxu0 %v3006_v33  ;;  %v3145_v60 = vsub.f32 %v2952_v19, %v368_v23  ;;  %v3150_v7 = vsub.f32 %v2957_v20, %v371_v24  ;;  %v3153_v8 = vsub.f32 %v324_v12, %v3133_v49  ;;  %v438_v53 = vand.u32 4294901760, %v437_v43 }
  0x2b   : > { %2149 = vmatprep.mubr.f32.mxu1 %v428_v51  ;;  %v326_v51 = vld [vmem:[%s2962_s11 + $0x38] sm:$0xff]  ;;  %3625 = vst [vmem:[#allocation14_spill] sm:$0xff] %v3138_v62  ;;  %v536_v54 = vsub.f32 %v3079_v63, %v535_v18  ;;  %v543_v17 = vsub.f32 %v3087_v1, %v542_v37  ;;  %v550_v19 = vsub.f32 %v3092_v2, %v3597_v42  ;;  %v466_v24 = vand.u32 4294901760, %v3131_v45 }
  0x2c   : > { %v3162_v23 = vand.u32 4294901760, %v326_v51  ;;  %v447_v20 = vsub.f32 %v3102_v5, %v446_v44  ;;  %v3167_v12 = vsub.f32 %v325_v31, %v3138_v62  ;;  %v557_v47 = vsub.f32 %v3109_v9, %v556_v57 }
  0x2d   : > { %2400 = vmatpush3.bf16.msra.mxu1 %v3006_v33  ;;  %2496 = vmatpush3.bf16.msra.mxu0 %v3006_v33  ;;  %v457_v46 = vsub.f32 %v3112_v11, %v456_v58  ;;  %v476_v4 = vand.u32 4294901760, %v3153_v8  ;;  %v563_v43 = vand.u32 4294901760, %v3145_v60  ;;  %v570_v42 = vand.u32 4294901760, %v3150_v7 }
  0x2e   : > { %2402 = vmatprep.subr.bf16.mxu1 %v3052_v50  ;;  %2498 = vmatprep.subr.bf16.mxu0 %v3052_v50  ;;  %3626 = vst [vmem:[#allocation15_spill] sm:$0xff] %v3162_v23  ;;  %v3173_v34 = vsub.f32 %v326_v51, %v3162_v23  ;;  %v3182_v31 = vsub.f32 %v2980_v25, %v374_v32  ;;  %v3627_v11 = vand.u32 4294901760, %v2987_v27  ;;  %v551_v28 = vand.u32 4294901760, %v550_v19 }
  0x2f   : > { %v2417_v51 = vpack.c.bf16 %v530_v0, %v523_v15  ;;  %v448_v33 = vand.u32 4294901760, %v447_v20  ;;  %v467_v23 = vsub.f32 %v3131_v45, %v466_v24  ;;  %v486_v62 = vand.u32 4294901760, %v3167_v12 }
  0x30   : > { %v3187_v5 = vsub.f32 %v2987_v27, %v3627_v11  ;;  %v3628_v25 = vand.u32 4294901760, %v3058_v55  ;;  %v558_v32 = vand.u32 4294901760, %v557_v47  ;;  %v458_v22 = vand.u32 4294901760, %v457_v46 }
  0x31   : > { %2404 = vmatpush3.bf16.msra.mxu1 %v3052_v50  ;;  %2500 = vmatpush3.bf16.msra.mxu0 %v3052_v50  ;;  %v544_v50 = vand.u32 4294901760, %v543_v17  ;;  %v477_v27 = vsub.f32 %v3153_v8, %v476_v4  ;;  %v496_v11 = vand.u32 4294901760, %v3173_v34  ;;  %v571_v15 = vsub.f32 %v3150_v7, %v570_v42 }
  0x32   : > { %2406 = vmatprep.subr.bf16.mxu1 %v3073_v61  ;;  %2502 = vmatprep.subr.bf16.mxu0 %v3073_v61  ;;  %v3629_v46 = vand.u32 4294901760, %v3012_v35  ;;  %v468_v0 = vand.u32 4294901760, %v467_v23  ;;  %v487_v17 = vsub.f32 %v3167_v12, %v486_v62  ;;  %v2425_v19 = vpack.c.bf16 %v558_v32, %v551_v28 }
  0x33   : > { %v3631_v20 = vand.u32 4294901760, %v3092_v2  ;;  %v3633_v23 = vand.u32 4294901760, %v3032_v41  ;;  %vm1535_vm1 = vcmask 1041409   ;;  %vm1537_vm2 = vcmask 1042434  }
  0x34   : > { %v3203_v47 = vsub.f32 %v3012_v35, %v3629_v46  ;;  %v497_v35 = vsub.f32 %v3173_v34, %v496_v11  ;;  %vm1539_vm3 = vcmask 1043459   ;;  %vm1541_vm4 = vcmask 1044484  }
  0x35   : > { %2408 = vmatpush3.bf16.msra.mxu1 %v3073_v61  ;;  %2504 = vmatpush3.bf16.msra.mxu0 %v3073_v61  ;;  %v537_v61 = vand.u32 4294901760, %v536_v54  ;;  %v564_v54 = vsub.f32 %v3145_v60, %v563_v43  ;;  %vm1543_vm5 = vcmask 1045509   ;;  %vm1545_vm6 = vcmask 1046534  }
  0x36   : > { %2410 = vmatprep.subr.bf16.mxu1 %v3098_v3  ;;  %2506 = vmatprep.subr.bf16.mxu0 %v3098_v3  ;;  %v591_v28 = vand.u32 4294901760, %v3203_v47  ;;  %v498_v32 = vand.u32 4294901760, %v497_v35  ;;  %vm1547_vm7 = vcmask 1047559   ;;  %vm1550_vm8 = vcmask 64512  }
  0x39   : > { %2412 = vmatpush3.bf16.msra.mxu1 %v3098_v3  ;;  %2508 = vmatpush3.bf16.msra.mxu0 %v3098_v3  ;;  %v2517_v3 = vpack.c.bf16 %v542_v37, %v535_v18  ;;  %v577_v18 = vand.u32 4294901760, %v3182_v31  ;;  %v584_v37 = vand.u32 4294901760, %v3187_v5 }
  0x3a   : > { %2414 = vmatprep.subr.bf16.mxu1 %v2413_v52  ;;  %2510 = vmatprep.subr.bf16.mxu0 %v2509_v14 }
  0x3c   : > { %2150 = vmatmul.mubr.f32.vlgmr.msra.gmra.mrb[0].mxu1 %v438_v53  ;;  %2282 = vmatmul.mubr.f32.vlgmr.msra.gmra.mrb[0].mxu0 %v3628_v25  ;;  %v2421_v53 = vpack.c.bf16 %v544_v50, %v537_v61  ;;  %v2521_v25 = vpack.c.bf16 %v556_v57, %v3631_v20  ;;  %v478_v50 = vand.u32 4294901760, %v477_v27  ;;  %v565_v61 = vand.u32 4294901760, %v564_v54 }
  0x3d   : > { %2416 = vmatpush3.bf16.msra.mxu1 %v2413_v52  ;;  %2512 = vmatpush3.bf16.msra.mxu0 %v2509_v14  ;;  %v3630_v52 = vand.u32 4294901760, %v3017_v36  ;;  %v2525_v54 = vpack.c.bf16 %v570_v42, %v563_v43  ;;  %v2445_v20 = vpack.c.bf16 %v2994_v30, %v2992_v29  ;;  %v2453_v29 = vpack.c.bf16 %v3087_v1, %v3079_v63  ;;  %v3634_v30 = vld [vmem:[#allocation6_spill] sm:$0xff]  ;;  %v3637_v63 = vld [vmem:[#allocation8_spill] sm:$0xff]  ;;  %v3638_v1 = vld [vmem:[#allocation7_spill] sm:$0xff] }
  0x3e   : > { %2418 = vmatprep.subr.bf16.mxu1 %v2417_v51  ;;  %2514 = vmatprep.subr.bf16.mxu0 %v3118_v21 }
  0x3f   : > { %v3208_v14 = vsub.f32 %v3017_v36, %v3630_v52  ;;  %2152 = vmatprep.mubr.f32.mxu1 %v448_v33  ;;  %2284 = vmatprep.mubr.f32.mxu0 %v446_v44  ;;  %v572_v36 = vand.u32 4294901760, %v571_v15  ;;  %v578_v33 = vsub.f32 %v3182_v31, %v577_v18  ;;  %v585_v44 = vsub.f32 %v3187_v5, %v584_v37 }
  0x40   : > { %2153 = vmatmul.mubr.f32.gmra.mrb[2].mxu1 %v458_v22  ;;  %2285 = vmatmul.mubr.f32.gmra.mrb[2].mxu0 %v456_v58  ;;  %v3632_v22 = vand.u32 4294901760, %v3027_v40 }
  0x41   : > { %2420 = vmatpush3.bf16.msra.mxu1 %v2417_v51  ;;  %2516 = vmatpush3.bf16.msra.mxu0 %v3118_v21  ;;  %v598_v57 = vand.u32 4294901760, %v3208_v14  ;;  %v3227_v21 = vsub.f32 %v3032_v41, %v3633_v23  ;;  %v488_v51 = vand.u32 4294901760, %v487_v17  ;;  %v2429_v27 = vpack.c.bf16 %v572_v36, %v565_v61 }
  0x42   : > { %2422 = vmatprep.subr.bf16.mxu1 %v2421_v53  ;;  %2518 = vmatprep.subr.bf16.mxu0 %v2517_v3  ;;  %v3222_v58 = vsub.f32 %v3027_v40, %v3632_v22  ;;  %v579_v15 = vand.u32 4294901760, %v578_v33  ;;  %v586_v46 = vand.u32 4294901760, %v585_v44  ;;  %v592_v40 = vsub.f32 %v3203_v47, %v591_v28 }
  0x43   : > { %2155 = vmatprep.mubr.f32.mxu1 %v468_v0  ;;  %2287 = vmatprep.mubr.f32.mxu0 %v466_v24  ;;  %v599_v52 = vsub.f32 %v3208_v14, %v598_v57  ;;  %v612_v24 = vand.u32 4294901760, %v3227_v21 }
  0x44   : > { %2156 = vmatmul.mubr.f32.gmra.mrb[4].mxu1 %v478_v50  ;;  %2288 = vmatmul.mubr.f32.gmra.mrb[4].mxu0 %v476_v4  ;;  %v605_v41 = vand.u32 4294901760, %v3222_v58  ;;  %v2529_v4 = vpack.c.bf16 %v584_v37, %v577_v18  ;;  %v593_v42 = vand.u32 4294901760, %v592_v40 }
  0x45   : > { %2424 = vmatpush3.bf16.msra.mxu1 %v2421_v53  ;;  %2520 = vmatpush3.bf16.msra.mxu0 %v2517_v3  ;;  %v2433_v3 = vpack.c.bf16 %v586_v46, %v579_v15  ;;  %v600_v43 = vand.u32 4294901760, %v599_v52  ;;  %v613_v0 = vsub.f32 %v3227_v21, %v612_v24 }
  0x46   : > { %2426 = vmatprep.subr.bf16.mxu1 %v2425_v19  ;;  %2522 = vmatprep.subr.bf16.mxu0 %v2521_v25  ;;  %v606_v53 = vsub.f32 %v3222_v58, %v605_v41 }
  0x47   : > { %2158 = vmatprep.mubr.f32.mxu1 %v488_v51  ;;  %2290 = vmatprep.mubr.f32.mxu0 %v486_v62  ;;  %v2437_v62 = vpack.c.bf16 %v600_v43, %v593_v42  ;;  %v614_v18 = vand.u32 4294901760, %v613_v0 }
  0x48   : > { %2159 = vmatmul.mubr.f32.gmra.mrb[6].mxu1 %v498_v32  ;;  %2291 = vmatmul.mubr.f32.gmra.mrb[6].mxu0 %v496_v11  ;;  %v2533_v11 = vpack.c.bf16 %v598_v57, %v591_v28  ;;  %v607_v17 = vand.u32 4294901760, %v606_v53 }
  0x49   : > { %2428 = vmatpush3.bf16.msra.mxu1 %v2425_v19  ;;  %2524 = vmatpush3.bf16.msra.mxu0 %v2521_v25  ;;  %v2537_v19 = vpack.c.bf16 %v612_v24, %v605_v41  ;;  %v2449_v25 = vpack.c.bf16 %v3043_v48, %v3020_v38  ;;  %v3635_v38 = vld [vmem:[#allocation14_spill] sm:$0xff]  ;;  %v3636_v48 = vld [vmem:[#allocation15_spill] sm:$0xff] }
  0x4a   : > { %2430 = vmatprep.subr.bf16.mxu1 %v2429_v27  ;;  %2526 = vmatprep.subr.bf16.mxu0 %v2525_v54  ;;  %v2441_v37 = vpack.c.bf16 %v614_v18, %v607_v17 }
  0x4b   : > { %2193 = vmatprep.mubr.f32.mxu1 %v2982_v26  ;;  %2325 = vmatprep.mubr.f32.mxu0 %v2982_v26 }
  0x4d   : > { %2432 = vmatpush3.bf16.msra.mxu1 %v2429_v27  ;;  %2528 = vmatpush3.bf16.msra.mxu0 %v2525_v54 }
  0x4e   : > { %2434 = vmatprep.subr.bf16.mxu1 %v2433_v3  ;;  %2530 = vmatprep.subr.bf16.mxu0 %v2529_v4 }
  0x51   : > { %2436 = vmatpush3.bf16.msra.mxu1 %v2433_v3  ;;  %2532 = vmatpush3.bf16.msra.mxu0 %v2529_v4 }
  0x52   : > { %2438 = vmatprep.subr.bf16.mxu1 %v2437_v62  ;;  %2534 = vmatprep.subr.bf16.mxu0 %v2533_v11 }
  0x55   : > { %2440 = vmatpush3.bf16.msra.mxu1 %v2437_v62  ;;  %2536 = vmatpush3.bf16.msra.mxu0 %v2533_v11 }
  0x56   : > { %2442 = vmatprep.subr.bf16.mxu1 %v2441_v37  ;;  %2538 = vmatprep.subr.bf16.mxu0 %v2537_v19 }
  0x59   : > { %2444 = vmatpush3.bf16.msra.mxu1 %v2441_v37  ;;  %2540 = vmatpush3.bf16.msra.mxu0 %v2537_v19 }
  0x5a   : > { %2446 = vmatprep.subr.bf16.mxu1 %v2445_v20  ;;  %2542 = vmatprep.subr.bf16.mxu0 %v2919_v10 }
  0x5c   : > { %2194 = vmatmul.mubr.f32.vlgmr.msra.gmra.mrb[0].mxu1 %v3022_v39  ;;  %2326 = vmatmul.mubr.f32.vlgmr.msra.gmra.mrb[0].mxu0 %v3022_v39 }
  0x5d   : > { %2448 = vmatpush3.bf16.msra.mxu1 %v2445_v20  ;;  %2544 = vmatpush3.bf16.msra.mxu0 %v2919_v10  ;;  %v2457_v10 = vpack.c.bf16 %v3109_v9, %v3092_v2  ;;  %v3639_v2 = vld [vmem:[#allocation9_spill] sm:$0xff]  ;;  %v2469_v9 = vpack.c.bf16 %v3208_v14, %v3203_v47 }
  0x5e   : > { %2450 = vmatprep.subr.bf16.mxu1 %v2449_v25  ;;  %2546 = vmatprep.subr.bf16.mxu0 %v2923_v13 }
  0x5f   : > { %2196 = vmatprep.mubr.f32.mxu1 %v3060_v56  ;;  %2328 = vmatprep.mubr.f32.mxu0 %v3060_v56 }
  0x60   : > { %2197 = vmatmul.mubr.f32.gmra.mrb[2].mxu1 %v3064_v59  ;;  %2329 = vmatmul.mubr.f32.gmra.mrb[2].mxu0 %v3064_v59 }
  0x61   : > { %2452 = vmatpush3.bf16.msra.mxu1 %v2449_v25  ;;  %2548 = vmatpush3.bf16.msra.mxu0 %v2923_v13  ;;  %v2461_v13 = vpack.c.bf16 %v3150_v7, %v3145_v60  ;;  %v3640_v60 = vld [vmem:[#allocation10_spill] sm:$0xff]  ;;  %v3642_v7 = vld [vmem:[#allocation12_spill] sm:$0xff] }
  0x62   : > { %2454 = vmatprep.subr.bf16.mxu1 %v2453_v29  ;;  %2550 = vmatprep.subr.bf16.mxu0 %v2945_v16 }
  0x63   : > { %2199 = vmatprep.mubr.f32.mxu1 %v3104_v6  ;;  %2331 = vmatprep.mubr.f32.mxu0 %v3104_v6 }
  0x64   : > { %2200 = vmatmul.mubr.f32.gmra.mrb[4].mxu1 %v3133_v49  ;;  %2332 = vmatmul.mubr.f32.gmra.mrb[4].mxu0 %v3133_v49 }
  0x65   : > { %2456 = vmatpush3.bf16.msra.mxu1 %v2453_v29  ;;  %2552 = vmatpush3.bf16.msra.mxu0 %v2945_v16  ;;  %v2465_v16 = vpack.c.bf16 %v3187_v5, %v3182_v31  ;;  %v2473_v5 = vpack.c.bf16 %v3227_v21, %v3222_v58  ;;  %v3643_v31 = vld [vmem:[#allocation13_spill] sm:$0xff] }
  0x66   : > { %2458 = vmatprep.subr.bf16.mxu1 %v2457_v10  ;;  %2554 = vmatprep.subr.bf16.mxu0 %v3634_v30 }
  0x67   : > { %2202 = vmatprep.mubr.f32.mxu1 %v3635_v38  ;;  %2334 = vmatprep.mubr.f32.mxu0 %v3635_v38 }
  0x68   : > { %2203 = vmatmul.mubr.f32.gmra.mrb[6].mxu1 %v3636_v48  ;;  %2335 = vmatmul.mubr.f32.gmra.mrb[6].mxu0 %v3636_v48 }
  0x69   : > { %2460 = vmatpush3.bf16.msra.mxu1 %v2457_v10  ;;  %2556 = vmatpush3.bf16.msra.mxu0 %v3634_v30 }
  0x6a   : > { %2462 = vmatprep.subr.bf16.mxu1 %v2461_v13  ;;  %2558 = vmatprep.subr.bf16.mxu0 %v3637_v63 }
  0x6b   : > { %2237 = vmatprep.mubr.f32.mxu1 %v3638_v1  ;;  %2369 = vmatprep.mubr.f32.mxu0 %v2982_v26  ;;  %v3641_v26 = vld [vmem:[#allocation11_spill] sm:$0xff] }
  0x6d   : > { %2464 = vmatpush3.bf16.msra.mxu1 %v2461_v13  ;;  %2560 = vmatpush3.bf16.msra.mxu0 %v3637_v63 }
  0x6e   : > { %2466 = vmatprep.subr.bf16.mxu1 %v2465_v16  ;;  %2562 = vmatprep.subr.bf16.mxu0 %v3639_v2 }
  0x71   : > { %2468 = vmatpush3.bf16.msra.mxu1 %v2465_v16  ;;  %2564 = vmatpush3.bf16.msra.mxu0 %v3639_v2 }
  0x72   : > { %2470 = vmatprep.subr.bf16.mxu1 %v2469_v9  ;;  %2566 = vmatprep.subr.bf16.mxu0 %v3640_v60 }
  0x75   : > { %2472 = vmatpush3.bf16.msra.mxu1 %v2469_v9  ;;  %2568 = vmatpush3.bf16.msra.mxu0 %v3640_v60 }
  0x76   : > { %2474 = vmatprep.subr.bf16.mxu1 %v2473_v5  ;;  %2570 = vmatprep.subr.bf16.mxu0 %v3641_v26 }
  0x79   : > { %2476 = vmatpush3.bf16.msra.mxu1 %v2473_v5  ;;  %2572 = vmatpush3.bf16.msra.mxu0 %v3641_v26 }
  0x7c   : > { %2238 = vmatmul.mubr.f32.vlgmr.msra.gmra.mrb[0].mxu1 %v3058_v55  ;;  %2370 = vmatmul.mubr.f32.vlgmr.msra.gmra.mrb[0].mxu0 %v3022_v39 }
  0x7d   : > { %2240 = vmatprep.mubr.f32.mxu1 %v3642_v7  ;;  %2372 = vmatprep.mubr.f32.mxu0 %v3060_v56  ;;  %v1963_v56 = vld [vmem:[%s3584_s2] ss:$0 sm:$0xff] }
  0x80   : > { %2241 = vmatmul.mubr.f32.gmra.mrb[2].mxu1 %v3643_v31  ;;  %2373 = vmatmul.mubr.f32.gmra.mrb[2].mxu0 %v3064_v59 }
  0x81   : > { %2243 = vmatprep.mubr.f32.mxu1 %v3131_v45  ;;  %2375 = vmatprep.mubr.f32.mxu0 %v3104_v6 }
  0x84   : > { %2244 = vmatmul.mubr.f32.gmra.mrb[4].mxu1 %v3153_v8  ;;  %2376 = vmatmul.mubr.f32.gmra.mrb[4].mxu0 %v3133_v49 }
  0x85   : > { %2246 = vmatprep.mubr.f32.mxu1 %v3167_v12  ;;  %2378 = vmatprep.mubr.f32.mxu0 %v3635_v38 }
  0x88   : > { %2247 = vmatmul.mubr.f32.gmra.mrb[6].mxu1 %v3173_v34  ;;  %2379 = vmatmul.mubr.f32.gmra.mrb[6].mxu0 %v3636_v48 }
 0x14f   : > { %v2239_v39 = vpop.f32.mrb[0].mxu1  ;;  %v2371_v55 = vpop.f32.mrb[0].mxu0 }
 0x150   : > { %v2573_v59 = vadd.f32 %v2371_v55, %v2239_v39  ;;  %v797_v6 = vpop.f32.mrb[1].mxu1  ;;  %v1239_v45 = vpop.f32.mrb[1].mxu0 }
 0x151   : > { %v2574_v8 = vadd.f32 %v1239_v45, %v797_v6 }
 0x152   : > { %v1293_v49 = vadd.f32 %v2573_v59, %v1963_v56 }
 0x153   : > { %v2242_v47 = vpop.f32.mrb[2].mxu1  ;;  %v2374_v12 = vpop.f32.mrb[2].mxu0  ;;  %v1292_v61 = vadd.f32 %v2574_v8, %v1963_v56 }
 0x154   : > { %v2575_v14 = vadd.f32 %v2374_v12, %v2242_v47  ;;  %v811_v50 = vpop.f32.mrb[3].mxu1  ;;  %v1251_v35 = vpop.f32.mrb[3].mxu0  ;;  %v1304_v34 = vsel %vm1300_vm0, %v1293_v49, 0.0 }
 0x155   : > { %v2576_v36 = vadd.f32 %v1251_v35, %v811_v50  ;;  %1305 = vadd.xlane.f32.xlu0 %v1304_v34  ;;  %v1301_v23 = vsel %vm1300_vm0, %v1292_v61, 0.0 }
 0x156   : > { %v1295_v33 = vadd.f32 %v2575_v14, %v1963_v56 }
 0x157   : > { %v2245_v44 = vpop.f32.mrb[4].mxu1  ;;  %v2377_v28 = vpop.f32.mrb[4].mxu0  ;;  %v1294_v51 = vadd.f32 %v2576_v36, %v1963_v56 }
 0x158   : > { %v2577_v57 = vadd.f32 %v2377_v28, %v2245_v44  ;;  %v825_v22 = vpop.f32.mrb[5].mxu1  ;;  %v1263_v58 = vpop.f32.mrb[5].mxu0  ;;  %v1310_v21 = vsel %vm1300_vm0, %v1295_v33, 0.0 }
 0x159   : > { %v2578_v32 = vadd.f32 %v1263_v58, %v825_v22  ;;  %1302 = vadd.xlane.f32.xlu0 %v1301_v23  ;;  %1311 = vadd.xlane.f32.xlu1 %v1310_v21  ;;  %v1307_v41 = vsel %vm1300_vm0, %v1294_v51, 0.0 }
 0x15a   : > { %v1297_v24 = vadd.f32 %v2577_v57, %v1963_v56 }
 0x15b   : > { %v2248_v27 = vpop.f32.mrb[6].mxu1  ;;  %v2380_v54 = vpop.f32.mrb[6].mxu0  ;;  %v1296_v15 = vadd.f32 %v2578_v32, %v1963_v56 }
 0x15c   : > { %v2579_v46 = vadd.f32 %v2380_v54, %v2248_v27  ;;  %v839_v40 = vpop.f32.mrb[7].mxu1  ;;  %v1275_v52 = vpop.f32.mrb[7].mxu0  ;;  %v1316_v43 = vsel %vm1300_vm0, %v1297_v24, 0.0 }
 0x15d   : > { %v2580_v3 = vadd.f32 %v1275_v52, %v839_v40  ;;  %1308 = vadd.xlane.f32.xlu1 %v1307_v41  ;;  %v1313_v4 = vsel %vm1300_vm0, %v1296_v15, 0.0 }
 0x15e   : > { %1314 = vadd.xlane.f32.xlu0 %v1313_v4  ;;  %v1299_v53 = vadd.f32 %v2579_v46, %v1963_v56 }
 0x15f   : > { %v1298_v42 = vadd.f32 %v2580_v3, %v1963_v56  ;;  %v1964_v3 = vld [vmem:[%s3585_s3] ss:$0 sm:$0xff] }
 0x160   : > { %v1322_v62 = vsel %vm1300_vm0, %v1299_v53, 0.0 }
 0x161   : > { %1317 = vadd.xlane.f32.xlu1 %v1316_v43  ;;  %v1319_v0 = vsel %vm1300_vm0, %v1298_v42, 0.0 }
 0x162   : > { %1320 = vadd.xlane.f32.xlu0 %v1319_v0 }
 0x165   : > { %1323 = vadd.xlane.f32.xlu1 %v1322_v62 }
 0x1e2   : > { %v1306_v11 = vpop.xlane.xlu0 %1305 }
 0x1e3   : > { %v1327_v17 = vmul.f32 0.03125, %v1306_v11 }
 0x1e5   : > { %v3310_v18 = vsub.f32 %v1293_v49, %v1327_v17  ;;  %v1965_v17 = vld [vmem:[%s3586_s4] ss:$0 sm:$0xff] }
 0x1e6   : > { %v1303_v37 = vpop.xlane.xlu0 %1302  ;;  %v1312_v19 = vpop.xlane.xlu1 %1311 }
 0x1e7   : > { %v1326_v20 = vmul.f32 0.03125, %v1303_v37  ;;  %v1329_v25 = vmul.f32 0.03125, %v1312_v19  ;;  %v1343_v29 = vmul.f32 %v3310_v18, %v3310_v18 }
 0x1e9   : > { %v3314_v10 = vsub.f32 %v1292_v61, %v1326_v20  ;;  %v3316_v30 = vsub.f32 %v1295_v33, %v1329_v25  ;;  %v1353_v13 = vsel %vm1300_vm0, %v1343_v29, 0.0 }
 0x1ea   : > { %v1309_v38 = vpop.xlane.xlu1 %1308  ;;  %1354 = vadd.xlane.f32.xlu1 %v1353_v13 }
 0x1eb   : > { %v1328_v48 = vmul.f32 0.03125, %v1309_v38  ;;  %v1315_v63 = vpop.xlane.xlu0 %1314  ;;  %v1345_v16 = vmul.f32 %v3316_v30, %v3316_v30  ;;  %v1342_v1 = vmul.f32 %v3314_v10, %v3314_v10 }
 0x1ec   : > { %v1330_v2 = vmul.f32 0.03125, %v1315_v63 }
 0x1ed   : > { %v3323_v9 = vsub.f32 %v1294_v51, %v1328_v48  ;;  %v1359_v60 = vsel %vm1300_vm0, %v1345_v16, 0.0  ;;  %v1350_v5 = vsel %vm1300_vm0, %v1342_v1, 0.0 }
 0x1ee   : > { %v3327_v26 = vsub.f32 %v1296_v15, %v1330_v2  ;;  %v1318_v7 = vpop.xlane.xlu1 %1317  ;;  %1360 = vadd.xlane.f32.xlu1 %v1359_v60  ;;  %1351 = vadd.xlane.f32.xlu0 %v1350_v5 }
 0x1ef   : > { %v1331_v31 = vmul.f32 0.03125, %v1318_v7  ;;  %v1321_v39 = vpop.xlane.xlu0 %1320  ;;  %v1344_v55 = vmul.f32 %v3323_v9, %v3323_v9 }
 0x1f0   : > { %v1332_v56 = vmul.f32 0.03125, %v1321_v39  ;;  %v1346_v45 = vmul.f32 %v3327_v26, %v3327_v26 }
 0x1f1   : > { %v3331_v59 = vsub.f32 %v1297_v24, %v1331_v31  ;;  %v1356_v6 = vsel %vm1300_vm0, %v1344_v55, 0.0 }
 0x1f2   : > { %v3336_v8 = vsub.f32 %v1298_v42, %v1332_v56  ;;  %v1324_v49 = vpop.xlane.xlu1 %1323  ;;  %1357 = vadd.xlane.f32.xlu0 %v1356_v6  ;;  %v1362_v35 = vsel %vm1300_vm0, %v1346_v45, 0.0 }
 0x1f3   : > { %v1333_v47 = vmul.f32 0.03125, %v1324_v49  ;;  %v1347_v12 = vmul.f32 %v3331_v59, %v3331_v59 }
 0x1f4   : > { %v1348_v34 = vmul.f32 %v3336_v8, %v3336_v8 }
 0x1f5   : > { %v3340_v14 = vsub.f32 %v1299_v53, %v1333_v47  ;;  %v1365_v50 = vsel %vm1300_vm0, %v1347_v12, 0.0 }
 0x1f6   : > { %1366 = vadd.xlane.f32.xlu1 %v1365_v50  ;;  %1363 = vadd.xlane.f32.xlu0 %v1362_v35  ;;  %v1368_v33 = vsel %vm1300_vm0, %v1348_v34, 0.0 }
 0x1f7   : > { %v1349_v61 = vmul.f32 %v3340_v14, %v3340_v14 }
 0x1f9   : > { %v1371_v36 = vsel %vm1300_vm0, %v1349_v61, 0.0 }
 0x1fa   : > { %1372 = vadd.xlane.f32.xlu1 %v1371_v36  ;;  %1369 = vadd.xlane.f32.xlu0 %v1368_v33 }
 0x277   : > { %v1355_v44 = vpop.xlane.xlu1 %1354 }
 0x278   : > { %v1375_v28 = vmul.f32 0.03125, %v1355_v44 }
 0x27a   : > { %v1383_v57 = vadd.f32 1e-05, %v1375_v28 }
 0x27b   : > { %v1361_v22 = vpop.xlane.xlu1 %1360  ;;  %v1352_v58 = vpop.xlane.xlu0 %1351 }
 0x27c   : > { %2657 = vrsqrt.f32 %v1383_v57  ;;  %v1377_v23 = vmul.f32 0.03125, %v1361_v22  ;;  %v1374_v21 = vmul.f32 0.03125, %v1352_v58 }
 0x27e   : > { %v1385_v51 = vadd.f32 1e-05, %v1377_v23  ;;  %v1382_v32 = vadd.f32 1e-05, %v1374_v21 }
 0x27f   : > { %v1358_v27 = vpop.xlane.xlu0 %1357 }
 0x280   : > { %2659 = vrsqrt.f32 %v1385_v51  ;;  %v1376_v54 = vmul.f32 0.03125, %v1358_v27 }
 0x281   : > { %2661 = vrsqrt.f32 %v1382_v32 }
 0x282   : > { %v1384_v15 = vadd.f32 1e-05, %v1376_v54 }
 0x283   : > { %v1367_v46 = vpop.xlane.xlu1 %1366  ;;  %v1364_v40 = vpop.xlane.xlu0 %1363 }
 0x284   : > { %2663 = vrsqrt.f32 %v1384_v15  ;;  %v1379_v52 = vmul.f32 0.03125, %v1367_v46  ;;  %v1378_v41 = vmul.f32 0.03125, %v1364_v40 }
 0x286   : > { %v2658_v24 = vpop.eup %2657  ;;  %v1387_v4 = vadd.f32 1e-05, %v1379_v52  ;;  %v1386_v42 = vadd.f32 1e-05, %v1378_v41 }
 0x287   : > { %v1399_v43 = vmul.f32 %v2658_v24, %v3310_v18  ;;  %v1373_v53 = vpop.xlane.xlu1 %1372  ;;  %v1370_v0 = vpop.xlane.xlu0 %1369 }
 0x288   : > { %2665 = vrsqrt.f32 %v1387_v4  ;;  %v1381_v62 = vmul.f32 0.03125, %v1373_v53  ;;  %v1380_v11 = vmul.f32 0.03125, %v1370_v0 }
 0x289   : > { %v1414_v37 = vmul.f32 %v1964_v3, %v1399_v43  ;;  %2667 = vrsqrt.f32 %v1386_v42  ;;  %v1501_v42 = vlaneseq }
 0x28a   : > { %v2660_v19 = vpop.eup %2659  ;;  %v1389_v20 = vadd.f32 1e-05, %v1381_v62  ;;  %v1388_v25 = vadd.f32 1e-05, %v1380_v11  ;;  %v1484_v62 = vstv %s1483_s22  ;;  %s3541_s22 = scalar_lea.sflag [#allocation4], %s299_s23 }
 0x28b   : > { %v2662_v29 = vpop.eup %2661  ;;  %v1401_v13 = vmul.f32 %v2660_v19, %v3316_v30  ;;  %v1429_v38 = vadd.f32 %v1965_v17, %v1414_v37  ;;  %v1502_v53 = vand.u32 127, %v1501_v42  ;;  %v3375_v0 = vshrl.u32 %v1501_v42, 7 }
 0x28c   : > { %v1398_v18 = vmul.f32 %v2662_v29, %v3314_v10  ;;  %2669 = vrsqrt.f32 %v1389_v20 }
 0x28d   : > { %v1416_v48 = vmul.f32 %v1964_v3, %v1401_v13  ;;  %2671 = vrsqrt.f32 %v1388_v25  ;;  %v3378_v37 = vsub.s32 %v1502_v53, %v3375_v0 }
 0x28e   : > { %v2664_v63 = vpop.eup %2663  ;;  %v1413_v16 = vmul.f32 %v1964_v3, %v1398_v18  ;;  %2673 = vtanh.f32 %v1429_v38 }
 0x28f   : > { %v1400_v1 = vmul.f32 %v2664_v63, %v3323_v9  ;;  %v1431_v2 = vadd.f32 %v1965_v17, %v1416_v48  ;;  %v1966_v9 = vld [vmem:[%s3587_s5] ss:$0 sm:$0xff] }
 0x290   : > { %v1428_v60 = vadd.f32 %v1965_v17, %v1413_v16 }
 0x291   : > { %v1415_v5 = vmul.f32 %v1964_v3, %v1400_v1  ;;  %2675 = vtanh.f32 %v1431_v2 }
 0x292   : > { %v2666_v7 = vpop.eup %2665  ;;  %2677 = vtanh.f32 %v1428_v60 }
 0x293   : > { %v2668_v31 = vpop.eup %2667  ;;  %v1403_v30 = vmul.f32 %v2666_v7, %v3331_v59  ;;  %v1430_v39 = vadd.f32 %v1965_v17, %v1415_v5 }
 0x294   : > { %v1402_v10 = vmul.f32 %v2668_v31, %v3327_v26 }
 0x295   : > { %v1418_v55 = vmul.f32 %v1964_v3, %v1403_v30  ;;  %2679 = vtanh.f32 %v1430_v39 }
 0x296   : > { %v2670_v56 = vpop.eup %2669  ;;  %v1417_v6 = vmul.f32 %v1964_v3, %v1402_v10 }
 0x297   : > { %v2672_v45 = vpop.eup %2671  ;;  %v1405_v49 = vmul.f32 %v2670_v56, %v3340_v14  ;;  %v1433_v47 = vadd.f32 %v1965_v17, %v1418_v55 }
 0x298   : > { %v2674_v12 = vpop.eup %2673  ;;  %v1404_v50 = vmul.f32 %v2672_v45, %v3336_v8  ;;  %v1432_v35 = vadd.f32 %v1965_v17, %v1417_v6 }
 0x299   : > { %v1420_v59 = vmul.f32 %v1964_v3, %v1405_v49  ;;  %v1452_v34 = vmul.f32 %v2674_v12, %v1966_v9  ;;  %2681 = vtanh.f32 %v1433_v47 }
 0x29a   : > { %v1419_v26 = vmul.f32 %v1964_v3, %v1404_v50  ;;  %2683 = vtanh.f32 %v1432_v35 }
 0x29b   : > { %v2676_v61 = vpop.eup %2675  ;;  %v1462_v36 = vsel %vm1300_vm0, %v1452_v34, 0.0  ;;  %v1435_v33 = vadd.f32 %v1965_v17, %v1420_v59  ;;  %v2793_v59 = vmov 0   ;;  %v1557_v34 = vsub.s32 0, %v3375_v0 }
 0x29c   : > { %v2678_v44 = vpop.eup %2677  ;;  %1463 = vadd.xlane.f32.xlu1 %v1462_v36  ;;  %v1454_v28 = vmul.f32 %v2676_v61, %v1966_v9  ;;  %v1434_v57 = vadd.f32 %v1965_v17, %v1419_v26  ;;  %2656 = vset.pattern.permute.xlu0 %v2793_v59  ;;  %v1561_v26 = vsub.s32 1, %v3375_v0  ;;  %v1565_v61 = vsub.s32 2, %v3375_v0 }
 0x29d   : > { %v1451_v22 = vmul.f32 %v2678_v44, %v1966_v9  ;;  %2685 = vtanh.f32 %v1435_v33  ;;  %2655 = vset.pattern.permute.xlu1 %v2793_v59  ;;  %v1569_v36 = vsub.s32 3, %v3375_v0 }
 0x29e   : > { %v1468_v14 = vsel %vm1300_vm0, %v1454_v28, 0.0  ;;  %2687 = vtanh.f32 %v1434_v57 }
 0x29f   : > { %v2680_v8 = vpop.eup %2679  ;;  %v1459_v58 = vsel %vm1300_vm0, %v1451_v22, 0.0  ;;  %v1573_v22 = vsub.s32 4, %v3375_v0 }
 0x2a0   : > { %1469 = vadd.xlane.f32.xlu1 %v1468_v14  ;;  %1460 = vadd.xlane.f32.xlu0 %v1459_v58  ;;  %v1453_v23 = vmul.f32 %v2680_v8, %v1966_v9 }
 0x2a2   : > { %v1465_v21 = vsel %vm1300_vm0, %v1453_v23, 0.0 }
 0x2a3   : > { %v2682_v51 = vpop.eup %2681 }
 0x2a4   : > { %v2684_v32 = vpop.eup %2683  ;;  %1466 = vadd.xlane.f32.xlu0 %v1465_v21  ;;  %v1456_v27 = vmul.f32 %v2682_v51, %v1966_v9 }
 0x2a5   : > { %v1455_v54 = vmul.f32 %v2684_v32, %v1966_v9  ;;  %v1577_v32 = vsub.s32 5, %v3375_v0 }
 0x2a6   : > { %v1474_v15 = vsel %vm1300_vm0, %v1456_v27, 0.0 }
 0x2a7   : > { %v2686_v46 = vpop.eup %2685  ;;  %1475 = vadd.xlane.f32.xlu1 %v1474_v15  ;;  %v1471_v40 = vsel %vm1300_vm0, %v1455_v54, 0.0 }
 0x2a8   : > { %v2688_v52 = vpop.eup %2687  ;;  %1472 = vadd.xlane.f32.xlu0 %v1471_v40  ;;  %v1458_v41 = vmul.f32 %v2686_v46, %v1966_v9  ;;  %v1581_v46 = vsub.s32 6, %v3375_v0 }
 0x2a9   : > { %v1457_v24 = vmul.f32 %v2688_v52, %v1966_v9 }
 0x2aa   : > { %v1480_v3 = vsel %vm1300_vm0, %v1458_v41, 0.0 }
 0x2ab   : > { %1481 = vadd.xlane.f32.xlu1 %v1480_v3  ;;  %v1477_v4 = vsel %vm1300_vm0, %v1457_v24, 0.0  ;;  %v1585_v24 = vsub.s32 7, %v3375_v0 }
 0x2ac   : > { %1478 = vadd.xlane.f32.xlu0 %v1477_v4 }
 0x329   : > { %v1464_v43 = vpop.xlane.xlu1 %1463 }
 0x32a   : > { %v1486_v19 = vadd.f32 %v1484_v62, %v1464_v43 }
 0x32c   : > { %v1510_v38 = vrot.slane %v1486_v19, %v3378_v37 }
 0x32d   : > { %v1461_v11 = vpop.xlane.xlu0 %1460  ;;  %v1470_v20 = vpop.xlane.xlu1 %1469 }
 0x32e   : > { %v1485_v17 = vadd.f32 %v1484_v62, %v1461_v11  ;;  %v1488_v18 = vadd.f32 %v1484_v62, %v1470_v20 }
 0x330   : > { %v1506_v25 = vrot.slane %v1485_v17, %v3378_v37  ;;  %v1518_v7 = vrot.slane %v1488_v18, %v3378_v37 }
 0x331   : > { %v1467_v29 = vpop.xlane.xlu0 %1466 }
 0x332   : > { %v1487_v13 = vadd.f32 %v1484_v62, %v1467_v29  ;;  %v1536_v16 = vsel %vm1535_vm1, %v1510_v38, %v1506_v25 }
 0x334   : > { %v1514_v48 = vrot.slane %v1487_v13, %v3378_v37  ;;  %v1476_v63 = vpop.xlane.xlu1 %1475 }
 0x335   : > { %v3384_v1 = vadd.f32 %v1484_v62, %v1476_v63  ;;  %v1473_v2 = vpop.xlane.xlu0 %1472 }
 0x336   : > { %v1538_v60 = vsel %vm1537_vm2, %v1514_v48, %v1536_v16  ;;  %v1489_v5 = vadd.f32 %v1484_v62, %v1473_v2 }
 0x337   : > { %v1526_v39 = vrot.slane %v3384_v1, %v3378_v37  ;;  %v1540_v10 = vsel %vm1539_vm3, %v1518_v7, %v1538_v60 }
 0x338   : > { %v1522_v31 = vrot.slane %v1489_v5, %v3378_v37  ;;  %v1482_v30 = vpop.xlane.xlu1 %1481 }
 0x339   : > { %v3392_v55 = vadd.f32 %v1484_v62, %v1482_v30  ;;  %v1479_v56 = vpop.xlane.xlu0 %1478 }
 0x33a   : > { %v1542_v6 = vsel %vm1541_vm4, %v1522_v31, %v1540_v10  ;;  %v1491_v9 = vadd.f32 %v1484_v62, %v1479_v56 }
 0x33b   : > { %v1534_v45 = vrot.slane %v3392_v55, %v3378_v37  ;;  %v1544_v47 = vsel %vm1543_vm5, %v1526_v39, %v1542_v6 }
 0x33c   : > { %v1530_v49 = vrot.slane %v1491_v9, %v3378_v37 }
 0x33e   : > { %v1546_v12 = vsel %vm1545_vm6, %v1530_v49, %v1544_v47 }
 0x33f   : > { %v1548_v50 = vsel %vm1547_vm7, %v1534_v45, %v1546_v12 }
 0x340   : > { %v1551_v35 = vsel %vm1550_vm8, %v1548_v50, -inf }
 0x341   : > { %1552 = vmax.xlane.f32.xlu0 %v1551_v35 }
 0x3ce   : > { %v1553_v33 = vpop.xlane.xlu0 %1552 }
 0x3cf   : > { %v1558_v44 = vrot.slane %v1553_v33, %v1557_v34  ;;  %v1562_v28 = vrot.slane %v1553_v33, %v1561_v26  ;;  %v1566_v57 = vrot.slane %v1553_v33, %v1565_v61  ;;  %v1570_v14 = vrot.slane %v1553_v33, %v1569_v36 }
 0x3d0   : > { %v1574_v27 = vrot.slane %v1553_v33, %v1573_v22  ;;  %v1578_v40 = vrot.slane %v1553_v33, %v1577_v32  ;;  %v1582_v3 = vrot.slane %v1553_v33, %v1581_v46  ;;  %v1586_v62 = vrot.slane %v1553_v33, %v1585_v24 }
 0x3d1   : > { %v1595_v8 = vsub.f32 %v1485_v17, %v1558_v44  ;;  %v1596_v58 = vsub.f32 %v1486_v19, %v1562_v28  ;;  %v1597_v23 = vsub.f32 %v1487_v13, %v1566_v57  ;;  %v1598_v54 = vsub.f32 %v1488_v18, %v1570_v14 }
 0x3d2   : > { %v1599_v52 = vsub.f32 %v1489_v5, %v1574_v27  ;;  %v1600_v4 = vsub.f32 %v3384_v1, %v1578_v40  ;;  %v1601_v11 = vsub.f32 %v1491_v9, %v1582_v3  ;;  %v1602_v20 = vsub.f32 %v3392_v55, %v1586_v62 }
 0x3d3   : > { %v1603_v21 = vmul.f32 1.442695, %v1595_v8  ;;  %v1605_v51 = vmul.f32 1.442695, %v1596_v58  ;;  %v1607_v15 = vmul.f32 1.442695, %v1597_v23 }
 0x3d4   : > { %v1609_v41 = vmul.f32 1.442695, %v1598_v54  ;;  %v1611_v42 = vmul.f32 1.442695, %v1599_v52  ;;  %v1613_v17 = vmul.f32 1.442695, %v1600_v4 }
 0x3d5   : > { %2689 = vpow2.f32 %v1603_v21  ;;  %v1615_v25 = vmul.f32 1.442695, %v1601_v11  ;;  %v1617_v13 = vmul.f32 1.442695, %v1602_v20 }
 0x3d6   : > { %2691 = vpow2.f32 %v1605_v51 }
 0x3d7   : > { %2693 = vpow2.f32 %v1607_v15 }
 0x3d8   : > { %2695 = vpow2.f32 %v1609_v41 }
 0x3d9   : > { %2697 = vpow2.f32 %v1611_v42 }
 0x3da   : > { %2699 = vpow2.f32 %v1613_v17  ;;  %v2722_v17 = vld [vmem:[%s2962_s11 + $0x8] sm:$0xff] }
 0x3db   : > { %2701 = vpow2.f32 %v1615_v25  ;;  %v2723_v25 = vld [vmem:[%s2962_s11 + $0x10] sm:$0xff] }
 0x3dc   : > { %2703 = vpow2.f32 %v1617_v13 }
 0x3df   : > { %v2690_v43 = vpop.eup %2689 }
 0x3e0   : > { %v3425_v53 = vpop.eup %2691  ;;  %1628 = vperm.xlu1 %2655, %v2690_v43  }
 0x3e1   : > { %1631 = vperm.xlu0 %2656, %v3425_v53   ;;  %v3430_v19 = vpop.eup %2693 }
 0x3e2   : > { %v3434_v29 = vpop.eup %2695 }
 0x3e3   : > { %v3437_v38 = vpop.eup %2697 }
 0x3e4   : > { %1634 = vperm.xlu1 %2655, %v3430_v19   ;;  %v3440_v18 = vpop.eup %2699 }
 0x3e5   : > { %v3443_v48 = vpop.eup %2701 }
 0x3e6   : > { %v3446_v63 = vpop.eup %2703 }
 0x3e8   : > { %1637 = vperm.xlu1 %2655, %v3434_v29  }
 0x3ec   : > { %1640 = vperm.xlu1 %2655, %v3437_v38  }
 0x3f0   : > { %1643 = vperm.xlu1 %2655, %v3440_v18  }
 0x3f4   : > { %1646 = vperm.xlu1 %2655, %v3443_v48  }
 0x3f8   : > { %1649 = vperm.xlu1 %2655, %v3446_v63  }
 0x45f   : > { %v1629_v16 = vpop.permute.xlu1 %1628 }
 0x460   : > { %v1632_v5 = vpop.permute.xlu0 %1631  ;;  %v1654_v30 = vrot.slane %v1629_v16, %v3378_v37 }
 0x461   : > { %v1658_v31 = vrot.slane %v1632_v5, %v3378_v37 }
 0x463   : > { %v1635_v1 = vpop.permute.xlu1 %1634  ;;  %v1683_v6 = vsel %vm1535_vm1, %v1658_v31, %v1654_v30 }
 0x464   : > { %v1662_v39 = vrot.slane %v1635_v1, %v3378_v37 }
 0x466   : > { %v1684_v45 = vsel %vm1537_vm2, %v1662_v39, %v1683_v6  ;;  %v2727_v6 = vld [vmem:[%s2962_s11 + $0x30] sm:$0xff] }
 0x467   : > { %v1638_v2 = vpop.permute.xlu1 %1637 }
 0x468   : > { %v1666_v10 = vrot.slane %v1638_v2, %v3378_v37 }
 0x46a   : > { %v1685_v47 = vsel %vm1539_vm3, %v1666_v10, %v1684_v45 }
 0x46b   : > { %v1641_v60 = vpop.permute.xlu1 %1640 }
 0x46c   : > { %v1670_v55 = vrot.slane %v1641_v60, %v3378_v37  ;;  %v2726_v60 = vld [vmem:[%s2962_s11 + $0x28] sm:$0xff] }
 0x46e   : > { %v1686_v12 = vsel %vm1541_vm4, %v1670_v55, %v1685_v47 }
 0x46f   : > { %v1644_v7 = vpop.permute.xlu1 %1643 }
 0x470   : > { %v1674_v9 = vrot.slane %v1644_v7, %v3378_v37 }
 0x472   : > { %v1687_v35 = vsel %vm1543_vm5, %v1674_v9, %v1686_v12 }
 0x473   : > { %v1647_v56 = vpop.permute.xlu1 %1646 }
 0x474   : > { %v1678_v49 = vrot.slane %v1647_v56, %v3378_v37 }
 0x476   : > { %v1688_v33 = vsel %vm1545_vm6, %v1678_v49, %v1687_v35 }
 0x477   : > { %v1650_v50 = vpop.permute.xlu1 %1649 }
 0x478   : > { %v1682_v59 = vrot.slane %v1650_v50, %v3378_v37 }
 0x47a   : > { %v1689_v44 = vsel %vm1547_vm7, %v1682_v59, %v1688_v33  ;;  %v2728_v59 = vld [vmem:[%s2962_s11 + $0x38] sm:$0xff] }
 0x47b   : > { %v1691_v28 = vsel %vm1550_vm8, %v1689_v44, 0.0 }
 0x47c   : > { %1692 = vadd.xlane.f32.xlu1 %v1691_v28 }
 0x509   : > { %v1693_v57 = vpop.xlane.xlu1 %1692 }
 0x50a   : > { %v1698_v14 = vrot.slane %v1693_v57, %v1557_v34  ;;  %v1702_v8 = vrot.slane %v1693_v57, %v1561_v26  ;;  %v1706_v58 = vrot.slane %v1693_v57, %v1565_v61  ;;  %v1710_v23 = vrot.slane %v1693_v57, %v1569_v36 }
 0x50b   : > { %v1714_v51 = vrot.slane %v1693_v57, %v1573_v22  ;;  %v1718_v34 = vrot.slane %v1693_v57, %v1577_v32  ;;  %v1722_v61 = vrot.slane %v1693_v57, %v1581_v46  ;;  %v1726_v22 = vrot.slane %v1693_v57, %v1585_v24 }
 0x50c   : > { %2705 = vrcp.f32 %v1698_v14 }
 0x50d   : > { %2707 = vrcp.f32 %v1702_v8 }
 0x50e   : > { %2709 = vrcp.f32 %v1706_v58 }
 0x50f   : > { %2711 = vrcp.f32 %v1710_v23 }
 0x510   : > { %2713 = vrcp.f32 %v1714_v51 }
 0x511   : > { %2715 = vrcp.f32 %v1718_v34 }
 0x512   : > { %2717 = vrcp.f32 %v1722_v61 }
 0x513   : > { %2719 = vrcp.f32 %v1726_v22 }
 0x516   : > { %v2706_v21 = vpop.eup %2705 }
 0x517   : > { %v1736_v27 = vmul.f32 %v2706_v21, %v2690_v43  ;;  %v2708_v54 = vpop.eup %2707 }
 0x518   : > { %v1738_v26 = vmul.f32 %v2708_v54, %v3425_v53  ;;  %v2710_v15 = vpop.eup %2709  ;;  %v2721_v53 = vld [vmem:[%s2962_s11] sm:$0xff] }
 0x519   : > { %1753 = vperm.xlu0 %2656, %v1736_v27   ;;  %v1740_v36 = vmul.f32 %v2710_v15, %v3430_v19  ;;  %v2712_v40 = vpop.eup %2711 }
 0x51a   : > { %v1742_v52 = vmul.f32 %v2712_v40, %v3434_v29  ;;  %v2714_v32 = vpop.eup %2713 }
 0x51b   : > { %v1744_v41 = vmul.f32 %v2714_v32, %v3437_v38  ;;  %v2716_v3 = vpop.eup %2715  ;;  %v2724_v38 = vld [vmem:[%s2962_s11 + $0x18] sm:$0xff] }
 0x51c   : > { %v1746_v46 = vmul.f32 %v2716_v3, %v3440_v18  ;;  %v2718_v4 = vpop.eup %2717 }
 0x51d   : > { %1758 = vperm.xlu0 %2656, %v1738_v26   ;;  %v1748_v0 = vmul.f32 %v2718_v4, %v3443_v48  ;;  %v2720_v24 = vpop.eup %2719 }
 0x51e   : > { %v1750_v42 = vmul.f32 %v2720_v24, %v3446_v63  ;;  %v2725_v63 = vld [vmem:[%s2962_s11 + $0x20] sm:$0xff]  ;;  %s2794_s11 = smov [#allocation3]  }
 0x51f   : > { %s2733_s27 = sshll.u32 %s2794_s11, 4  ;;  %s2734_s27 = int_to_ptr.vmem [resolvable:$false] %s2733_s27 }
 0x520   : > { %s2735_s28 = scalar_lea.vmem %s2734_s27, 2048  ;;  %p2736_p1 = scmp.lt.s32.totalorder %s3530_s13, %s2734_s27 }
 0x521   : > { %1763 = vperm.xlu0 %2656, %v1740_v36   ;;  %p2737_p2 = scmp.lt.s32.totalorder %s2735_s28, %s2729_s25 }
 0x523   : > { %p2738_p3 = por %p2737_p2, %p2736_p1 }
 0x525   : > { %1768 = vperm.xlu0 %2656, %v1742_v52   ;;  %p2739_p4 = pnand %p2738_p3, %p2732_p0 }
 0x529   : > { %1773 = vperm.xlu0 %2656, %v1744_v41  }
 0x52d   : > { %1778 = vperm.xlu0 %2656, %v1746_v46  }
 0x531   : > { %1783 = vperm.xlu0 %2656, %v1748_v0  }
 0x535   : > { %1788 = vperm.xlu0 %2656, %v1750_v42  }
 0x598   : > { %v1754_v43 = vpop.permute.xlu0 %1753 }
 0x599   : > { %v1791_v62 = vmul.f32 %v2721_v53, %v1754_v43  ;;  %v1810_v31 = vrot.slane %v1754_v43, %v3378_v37 }
 0x59b   : > { %1799 = vst [vmem:[%s3492_s26] sm:$0xff] %v1791_v62 }
 0x59c   : > { %v1759_v11 = vpop.permute.xlu0 %1758 }
 0x59d   : > { %v1792_v19 = vmul.f32 %v2722_v17, %v1759_v11  ;;  %v1814_v2 = vrot.slane %v1759_v11, %v3378_v37 }
 0x59f   : > { %1800 = vst [vmem:[%s3492_s26 + $0x8] sm:$0xff] %v1792_v19  ;;  %v1839_v55 = vsel %vm1535_vm1, %v1814_v2, %v1810_v31 }
 0x5a0   : > { %v1764_v20 = vpop.permute.xlu0 %1763 }
 0x5a1   : > { %v1793_v29 = vmul.f32 %v2723_v25, %v1764_v20  ;;  %v1818_v7 = vrot.slane %v1764_v20, %v3378_v37 }
 0x5a3   : > { %1801 = vst [vmem:[%s3492_s26 + $0x10] sm:$0xff] %v1793_v29  ;;  %v1840_v45 = vsel %vm1537_vm2, %v1818_v7, %v1839_v55 }
 0x5a4   : > { %v1769_v13 = vpop.permute.xlu0 %1768 }
 0x5a5   : > { %v1794_v18 = vmul.f32 %v2724_v38, %v1769_v13  ;;  %v1822_v30 = vrot.slane %v1769_v13, %v3378_v37 }
 0x5a7   : > { %1802 = vst [vmem:[%s3492_s26 + $0x18] sm:$0xff] %v1794_v18  ;;  %v1841_v47 = vsel %vm1539_vm3, %v1822_v30, %v1840_v45 }
 0x5a8   : > { %v1774_v48 = vpop.permute.xlu0 %1773 }
 0x5a9   : > { %v1795_v16 = vmul.f32 %v2725_v63, %v1774_v48  ;;  %v1826_v39 = vrot.slane %v1774_v48, %v3378_v37 }
 0x5ab   : > { %1803 = vst [vmem:[%s3492_s26 + $0x20] sm:$0xff] %v1795_v16  ;;  %v1842_v12 = vsel %vm1541_vm4, %v1826_v39, %v1841_v47 }
 0x5ac   : > { %v1779_v1 = vpop.permute.xlu0 %1778 }
 0x5ad   : > { %v1796_v5 = vmul.f32 %v2726_v60, %v1779_v1  ;;  %v1830_v56 = vrot.slane %v1779_v1, %v3378_v37 }
 0x5af   : > { %1804 = vst [vmem:[%s3492_s26 + $0x28] sm:$0xff] %v1796_v5  ;;  %v1843_v35 = vsel %vm1543_vm5, %v1830_v56, %v1842_v12 }
 0x5b0   : > { %v1784_v10 = vpop.permute.xlu0 %1783 }
 0x5b1   : > { %v1797_v9 = vmul.f32 %v2727_v6, %v1784_v10  ;;  %v1834_v49 = vrot.slane %v1784_v10, %v3378_v37 }
 0x5b3   : > { %1805 = vst [vmem:[%s3492_s26 + $0x30] sm:$0xff] %v1797_v9  ;;  %v1844_v28 = vsel %vm1545_vm6, %v1834_v49, %v1843_v35 }
 0x5b4   : > { %v1789_v50 = vpop.permute.xlu0 %1788 }
 0x5b5   : > { %v1798_v33 = vmul.f32 %v2728_v59, %v1789_v50  ;;  %v1838_v44 = vrot.slane %v1789_v50, %v3378_v37 }
 0x5b7   : > { %1806 = vst [vmem:[%s3492_s26 + $0x38] sm:$0xff] %v1798_v33  ;;  %v1845_v57 = vsel %vm1547_vm7, %v1838_v44, %v1844_v28 }
 0x5b8   : > { %1847 = vst.msk [vmem:[%s318_s19] sm:$0xff] %vm1550_vm8, %v1845_v57 }
 0x5b9   : > { %2742 = shalt.err (!%p2739_p4)
}
 0x5ba   : > { %s2743_s23 = scalar_lea.hbm %s3528_s21, 1024  ;;  %s2747_s14 = scalar_lea.hbm %s3589_s7, 2048 }
 0x5bb   : > { %p2744_p7 = scmp.ne.s32.totalorder %s3528_s21, %s2743_s23  ;;  %p2748_p10 = scmp.lt.u32.totalorder %s3528_s21, %s3589_s7 }
 0x5bc   : > { %p2749_p11 = scmp.lt.u32.totalorder %s2747_s14, %s2743_s23  ;;  %p2751_p13 = scmp.lt.u32.totalorder %s2743_s23, %s3528_s21 }
 0x5bd   : > { %p2745_p8 = pnand %p2744_p7, %p2883_p5 }
 0x5be   : > { %p2750_p12 = por %p2749_p11, %p2748_p10 }
 0x5bf   : > { %p2746_p9 = pneg %p2745_p8 }
 0x5c0   : > { %p2752_p0 = por %p2751_p13, %p2750_p12 }
 0x5c2   : > { %p2753_p1 = pnand %p2752_p0, %p2746_p9 }
 0x5c4   : > { %2756 = shalt.err (!%p2753_p1)
}
 0x5c5   : > { %s2795_s20 = smov 128   ;;  %s2796_s6 = smov 8  }
 0x5c6   : > { %2613 = dma.vmem_to_hbm [thread:$0]  (%p2883_p5), %s3530_s13, 1024, %s3528_s21, %s3541_s22, %s2795_s20, %s2795_s20, %s2796_s6  }
 0x5c7 PF: > { %p2619_p2 = scmp.ge.s32.totalorder %s2791_s10, 2  ;;  %s1884_s25 = sand.u32 1, %s2779_s29  }
 0x5c8   : > { %s1885_s11 = scalar_lea.sflag [#allocation4], %s1884_s25 }
 0x5c9   : > { %p2616_p3 = pnand %p2619_p2, %p2887_p6 }
 0x5cb   : > { %2774 = dma.done.wait (!%p2616_p3), %s1885_s11, 1024  }
 0x5cc   : > { %2776 = vsyncadd (!%p2616_p3), %s1885_s11, 4294966272  ;;  %p20_p4 = scmp.ge.s32.totalorder %s2870_s12, 4   ;;  %s3644_s29 = smov %s2783_s30 }
 0x5cd   : > { %s3645_s30 = smov %s2787_s9  ;;  %s3646_s9 = smov %s2881_s15 }
 0x5ce   : > { %s3647_s10 = smov %s2870_s12  ;;  %22 = sbr.rel (!%p20_p4) target bundleno = 5 (0x5), region = 95 }
 0x5d5   :  { %1897 = vsyncpa [#allocation4], 1 }
 0x5d6   :  { %1899 = vsyncpa [#allocation4 + $0x1], 1 }

</bundles_post_ra>
